<compile_context>
chip_gen: v7x
topology: tpu7x:2x2x1
jax: 0.10.0
libtpu: 0.0.40
codegen_flags: <defaults>
</compile_context>

<pallas_src>
import functools
import math

import jax
import jax.numpy as jnp
from jax.experimental import pallas as pl
from jax.experimental.pallas import tpu as pltpu


# ----------------------------- hardware-derived knobs ---------------------- #

def _vmem_capacity_bytes():
    try:
        return int(pltpu.get_tpu_info().vmem_capacity_bytes)
    except Exception:
        return 64 * 1024 * 1024        # conservative fallback (v7x-sized)


_VMEM_CAP = _vmem_capacity_bytes()
_VMEM_LIMIT = int(_VMEM_CAP * 0.85)    # leave headroom for double buffers/scratch

if _VMEM_CAP >= 100 * 1024 * 1024:     # v5e / v6e: 128 MiB physical VMEM
    _TM_TARGET, _TN_TARGET, _TK_TARGET = 512, 512, 1024
else:                                  # v7x: 64 MiB physical VMEM
    _TM_TARGET, _TN_TARGET, _TK_TARGET = 256, 256, 512

_TQ_TARGET = 256                       # attention query-row tile


def _pick_tile(dim, target, align):
    """Largest divisor of `dim` that is <= target and a multiple of `align`.

    Small dims use the full extent (always a legal block).  Ragged dims that
    have no aligned divisor fall back to the full dim.
    """
    if dim <= target:
        return dim
    if dim % target == 0:
        return target
    t = (target // align) * align
    while t >= align:
        if dim % t == 0:
            return t
        t -= align
    # TODO(synk): pad ragged dims to a tile multiple instead of an untiled block.
    return dim


# ----------------------------- Pallas kernels ------------------------------ #

def _matmul_kernel(x_ref, w_ref, b_ref, o_ref, acc_ref, *, activation):
    """Tiled matmul: acc += x @ w; bias (+ReLU) applied on the last K step."""
    @pl.when(pl.program_id(2) == 0)
    def _():
        acc_ref[...] = jnp.zeros_like(acc_ref)

    acc_ref[...] += jnp.dot(x_ref[...], w_ref[...],
                            preferred_element_type=jnp.float32)

    @pl.when(pl.program_id(2) == pl.num_programs(2) - 1)
    def _():
        y = acc_ref[...] + b_ref[...]
        if activation == "relu":
            y = jnp.maximum(y, 0.0)
        o_ref[...] = y.astype(o_ref.dtype)


def matmul(x, w, b, activation=None, out_dtype=jnp.float32):
    """y = x @ w + b (optionally fused ReLU).  x: [M, K] -> [M, N]."""
    M, K = x.shape
    N = w.shape[1]
    tm = _pick_tile(M, _TM_TARGET, 8)
    tn = _pick_tile(N, _TN_TARGET, 128)
    tk = _pick_tile(K, _TK_TARGET, 128)

    x = x.astype(jnp.bfloat16)          # no-op: callers keep activations in bf16
    w = w.astype(jnp.bfloat16)
    b = b.reshape(1, N).astype(jnp.float32)

    return pl.pallas_call(
        functools.partial(_matmul_kernel, activation=activation),
        out_shape=jax.ShapeDtypeStruct((M, N), out_dtype),
        grid=(M // tm, N // tn, K // tk),
        in_specs=[
            pl.BlockSpec((tm, tk), lambda i, j, k: (i, k)),
            pl.BlockSpec((tk, tn), lambda i, j, k: (k, j)),
            pl.BlockSpec((1, tn), lambda i, j, k: (0, j)),
        ],
        out_specs=pl.BlockSpec((tm, tn), lambda i, j, k: (i, j)),
        scratch_shapes=[pltpu.VMEM((tm, tn), jnp.float32)],
        compiler_params=pltpu.CompilerParams(
            dimension_semantics=("parallel", "parallel", "arbitrary"),
            vmem_limit_bytes=_VMEM_LIMIT,
        ),
    )(x, w, b)


def _matmul_split_kernel(x_ref, w_ref, b_ref, oq_ref, okv_ref, acc_ref, *, d_model):
    """acc += x @ w_qkv; on last K step split bias-added result into q and kv."""
    @pl.when(pl.program_id(1) == 0)
    def _():
        acc_ref[...] = jnp.zeros_like(acc_ref)

    acc_ref[...] += jnp.dot(x_ref[...], w_ref[...],
                            preferred_element_type=jnp.float32)

    @pl.when(pl.program_id(1) == pl.num_programs(1) - 1)
    def _():
        y = acc_ref[...] + b_ref[...]
        oq_ref[...] = y[:, :d_model].astype(oq_ref.dtype)     # static lane slice
        okv_ref[...] = y[:, d_model:].astype(okv_ref.dtype)


def matmul_qkv(x, w, b, d_model):
    """Fused QKV projection emitting (q [M,D], kv [M,2D]) — no XLA slicing."""
    M, K = x.shape
    N = w.shape[1]                      # 3 * d_model
    tm = _pick_tile(M, _TM_TARGET, 8)
    tk = _pick_tile(K, _TK_TARGET, 128)

    x = x.astype(jnp.bfloat16)
    w = w.astype(jnp.bfloat16)

    # Rough VMEM estimate of the full-N fused path; fall back if it won't fit.
    fused_bytes = (2 * tk * N * 2          # double-buffered bf16 weight
                   + tm * N * 4            # f32 accumulator
                   + 2 * tm * N * 2        # double-buffered bf16 outputs
                   + 2 * tm * tk * 2)      # double-buffered bf16 x
    if fused_bytes > int(0.6 * _VMEM_LIMIT):
        # TODO(synk): tile N inside the split projection instead of XLA slices.
        qkv = matmul(x, w, b, out_dtype=jnp.bfloat16)
        return qkv[:, :d_model], qkv[:, d_model:]

    return pl.pallas_call(
        functools.partial(_matmul_split_kernel, d_model=d_model),
        out_shape=(jax.ShapeDtypeStruct((M, d_model), jnp.bfloat16),
                   jax.ShapeDtypeStruct((M, 2 * d_model), jnp.bfloat16)),
        grid=(M // tm, K // tk),
        in_specs=[
            pl.BlockSpec((tm, tk), lambda i, k: (i, k)),
            pl.BlockSpec((tk, N), lambda i, k: (k, 0)),
            pl.BlockSpec((1, N), lambda i, k: (0, 0)),
        ],
        out_specs=(pl.BlockSpec((tm, d_model), lambda i, k: (i, 0)),
                   pl.BlockSpec((tm, 2 * d_model), lambda i, k: (i, 0))),
        scratch_shapes=[pltpu.VMEM((tm, N), jnp.float32)],
        compiler_params=pltpu.CompilerParams(
            dimension_semantics=("parallel", "arbitrary"),
            vmem_limit_bytes=_VMEM_LIMIT,
        ),
    )(x, w, b.reshape(1, N).astype(jnp.float32))


def _matmul_add_ln_kernel(x_ref, w_ref, b_ref, r_ref, g_ref, be_ref,
                          o_ref, acc_ref, *, eps):
    """acc += x @ w; on last K step: z = acc + bias + residual; LayerNorm(z)."""
    @pl.when(pl.program_id(1) == 0)
    def _():
        acc_ref[...] = jnp.zeros_like(acc_ref)

    acc_ref[...] += jnp.dot(x_ref[...], w_ref[...],
                            preferred_element_type=jnp.float32)

    @pl.when(pl.program_id(1) == pl.num_programs(1) - 1)
    def _():
        z = acc_ref[...] + b_ref[...] + r_ref[...].astype(jnp.float32)
        mu = jnp.mean(z, axis=-1, keepdims=True)
        var = jnp.mean(jnp.square(z - mu), axis=-1, keepdims=True)
        y = (z - mu) * jax.lax.rsqrt(var + eps) * g_ref[...] + be_ref[...]
        o_ref[...] = y.astype(o_ref.dtype)


def _add_ln_kernel(y_ref, r_ref, g_ref, be_ref, o_ref, *, eps):
    z = y_ref[...].astype(jnp.float32) + r_ref[...].astype(jnp.float32)
    mu = jnp.mean(z, axis=-1, keepdims=True)
    var = jnp.mean(jnp.square(z - mu), axis=-1, keepdims=True)
    o_ref[...] = ((z - mu) * jax.lax.rsqrt(var + eps) * g_ref[...]
                  + be_ref[...]).astype(o_ref.dtype)


def add_ln(y, residual, gamma, beta, eps):
    """Standalone LayerNorm(residual + y) — fallback for very large N."""
    M, N = y.shape
    tm = _pick_tile(M, _TM_TARGET, 8)
    return pl.pallas_call(
        functools.partial(_add_ln_kernel, eps=eps),
        out_shape=jax.ShapeDtypeStruct((M, N), jnp.bfloat16),
        grid=(M // tm,),
        in_specs=[
            pl.BlockSpec((tm, N), lambda i: (i, 0)),
            pl.BlockSpec((tm, N), lambda i: (i, 0)),
            pl.BlockSpec((1, N), lambda i: (0, 0)),
            pl.BlockSpec((1, N), lambda i: (0, 0)),
        ],
        out_specs=pl.BlockSpec((tm, N), lambda i: (i, 0)),
        compiler_params=pltpu.CompilerParams(
            dimension_semantics=("parallel",),
            vmem_limit_bytes=_VMEM_LIMIT,
        ),
    )(y, residual, gamma.reshape(1, N).astype(jnp.float32),
      beta.reshape(1, N).astype(jnp.float32))


def matmul_add_ln(x, w, b, residual, gamma, beta, eps=1e-5):
    """bf16 LayerNorm(residual + x @ w + b) fused in one kernel (f32 stats)."""
    M, K = x.shape
    N = w.shape[1]
    tm = _pick_tile(M, _TM_TARGET, 8)
    tk = _pick_tile(K, _TK_TARGET, 128)

    x = x.astype(jnp.bfloat16)
    w = w.astype(jnp.bfloat16)
    residual = residual.astype(jnp.bfloat16)

    # Full-N blocks (LayerNorm reduces over N).  If they would exceed the VMEM
    # budget (huge d_model on v7x), fall back to tiled matmul + separate LN.
    fused_bytes = (2 * tk * N * 2          # double-buffered bf16 weight
                   + tm * N * 4            # f32 accumulator
                   + 4 * tm * N * 2        # double-buffered bf16 residual + out
                   + 2 * tm * tk * 2)      # double-buffered bf16 x
    if fused_bytes > int(0.6 * _VMEM_LIMIT):
        # TODO(synk): stream LN sum / sum-of-squares across N tiles instead.
        y = matmul(x, w, b, out_dtype=jnp.float32)
        return add_ln(y, residual, gamma, beta, eps)

    return pl.pallas_call(
        functools.partial(_matmul_add_ln_kernel, eps=eps),
        out_shape=jax.ShapeDtypeStruct((M, N), jnp.bfloat16),
        grid=(M // tm, K // tk),
        in_specs=[
            pl.BlockSpec((tm, tk), lambda i, k: (i, k)),
            pl.BlockSpec((tk, N), lambda i, k: (k, 0)),
            pl.BlockSpec((1, N), lambda i, k: (0, 0)),
            pl.BlockSpec((tm, N), lambda i, k: (i, 0)),
            pl.BlockSpec((1, N), lambda i, k: (0, 0)),
            pl.BlockSpec((1, N), lambda i, k: (0, 0)),
        ],
        out_specs=pl.BlockSpec((tm, N), lambda i, k: (i, 0)),
        scratch_shapes=[pltpu.VMEM((tm, N), jnp.float32)],
        compiler_params=pltpu.CompilerParams(
            dimension_semantics=("parallel", "arbitrary"),
            vmem_limit_bytes=_VMEM_LIMIT,
        ),
    )(x, w, b.reshape(1, N).astype(jnp.float32), residual,
      gamma.reshape(1, N).astype(jnp.float32),
      beta.reshape(1, N).astype(jnp.float32))


def _attn_kernel(q_ref, kv_ref, o_ref, *, num_heads, scale, d_model):
    """Attention for one batch element / one Sq tile, all heads.

    q_ref: [1, tq, D]; kv_ref: [1, Sk, 2D] (K in cols [0:D], V in [D:2D]).
    Head split happens in-kernel on static lane slices; each head's output is
    stored immediately into its column slice of the output block.
    """
    dk = d_model // num_heads
    q = q_ref[0]             # [tq, D]   (bf16)
    kv = kv_ref[0]           # [Sk, 2D]  (bf16)

    for h in range(num_heads):                       # static, unrolled
        qh = q[:, h * dk:(h + 1) * dk]
        kh = kv[:, h * dk:(h + 1) * dk]
        vh = kv[:, d_model + h * dk:d_model + (h + 1) * dk]
        # Contract on last axes of both operands (MXU handles the transpose).
        s = jax.lax.dot_general(qh, kh, (((1,), (1,)), ((), ())),
                                preferred_element_type=jnp.float32) * scale
        m = jnp.max(s, axis=-1, keepdims=True)
        p = jnp.exp(s - m)
        denom = jnp.sum(p, axis=-1, keepdims=True)
        p = p * pl.reciprocal(denom, approx=True)
        out_h = jnp.dot(p.astype(vh.dtype), vh,
                        preferred_element_type=jnp.float32)
        o_ref[0, :, h * dk:(h + 1) * dk] = out_h.astype(o_ref.dtype)


def attention(q, kv, num_heads):
    """softmax(QK^T/sqrt(dk))V per head.  q: [B, Sq, D], kv: [B, Sk, 2D]."""
    B, Sq, D = q.shape
    Sk = kv.shape[1]
    scale = 1.0 / math.sqrt(D // num_heads)
    tq = _pick_tile(Sq, _TQ_TARGET, 8)
    # TODO(synk): for long sequences add a KV grid axis with online-softmax
    # scratch (flash-style streaming) instead of the full [tq, Sk] score tile.
    return pl.pallas_call(
        functools.partial(_attn_kernel, num_heads=num_heads, scale=scale,
                          d_model=D),
        out_shape=jax.ShapeDtypeStruct((B, Sq, D), jnp.bfloat16),
        grid=(B, Sq // tq),
        in_specs=[
            pl.BlockSpec((1, tq, D), lambda b, i: (b, i, 0)),
            pl.BlockSpec((1, Sk, 2 * D), lambda b, i: (b, 0, 0)),
        ],
        out_specs=pl.BlockSpec((1, tq, D), lambda b, i: (b, i, 0)),
        compiler_params=pltpu.CompilerParams(
            dimension_semantics=("parallel", "parallel"),
            vmem_limit_bytes=_VMEM_LIMIT,
        ),
    )(q, kv)


# ------------------------------ model pieces ------------------------------- #

def decoder_layer(p, x, enc, num_heads):
    """x: [B, S, D] bf16 residual stream; enc: [B, Se, D] bf16 encoder output."""
    B, S, D = x.shape
    Se = enc.shape[1]
    x2 = x.reshape(B * S, D)                                # bf16 residual stream

    # --- self attention (fused QKV projection -> (q, kv) outputs, no mask) ---
    q, kv = matmul_qkv(x2, p["sa_wqkv"], p["sa_bqkv"], d_model=D)
    sa = attention(q.reshape(B, S, D), kv.reshape(B, S, 2 * D),
                   num_heads).reshape(B * S, D)
    # output projection fused with residual add + LayerNorm (norm1)
    x2 = matmul_add_ln(sa, p["sa_wo"], p["sa_bo"], x2, p["g1"], p["be1"])

    # --- encoder-decoder (cross) attention (fused KV projection) ---
    e2 = enc.reshape(B * Se, D)
    q = matmul(x2, p["ca_wq"], p["ca_bq"], out_dtype=jnp.bfloat16)
    kv = matmul(e2, p["ca_wkv"], p["ca_bkv"], out_dtype=jnp.bfloat16)
    ca = attention(q.reshape(B, S, D), kv.reshape(B, Se, 2 * D),
                   num_heads).reshape(B * S, D)
    x2 = matmul_add_ln(ca, p["ca_wo"], p["ca_bo"], x2, p["g2"], p["be2"])

    # --- feed forward (ReLU fused into first matmul, add+LN into second) ---
    h = matmul(x2, p["w1"], p["b1"], activation="relu", out_dtype=jnp.bfloat16)
    x2 = matmul_add_ln(h, p["w2"], p["b2"], x2, p["g3"], p["be3"])

    return x2.reshape(B, S, D)


def positional_encoding(seq_len, d_model):
    # Assumes even d_model (sin/cos interleave), as in the reference module.
    pos = jnp.arange(seq_len, dtype=jnp.float32)[:, None]
    i = jnp.arange(0, d_model, 2, dtype=jnp.float32)
    angle = pos / jnp.power(10000.0, i / d_model)
    pe = jnp.zeros((seq_len, d_model), jnp.float32)
    pe = pe.at[:, 0::2].set(jnp.sin(angle))
    pe = pe.at[:, 1::2].set(jnp.cos(angle))
    return pe


def decoder_forward(params, tokens, encoder_output, num_heads):
    """tokens: [B, S] int32, encoder_output: [B, S_enc, D] -> [B, S, output_dim]."""
    B, S = tokens.shape
    x = jnp.take(params["embedding"], tokens, axis=0)            # [B, S, D] f32
    D = x.shape[-1]
    # Single cast into the bf16 residual stream (kernels keep f32 internally).
    x = (x + positional_encoding(S, D)[None, :, :]).astype(jnp.bfloat16)
    enc = encoder_output.astype(jnp.bfloat16)
    for layer_p in params["layers"]:
        x = decoder_layer(layer_p, x, enc, num_heads)
    # TODO(synk): pad output_dim to a multiple of 128 for lane-dense stores.
    out = matmul(x.reshape(B * S, D), params["out_w"], params["out_b"],
                 out_dtype=jnp.float32)
    return out.reshape(B, S, params["out_w"].shape[1])


# ----------------------------- param init (synthetic) ---------------------- #

def init_params(key, input_dim, hidden_dim, num_heads, num_layers, ff_dim, output_dim):
    keys = iter(jax.random.split(key, 4 + 12 * num_layers))

    def dense(din, dout):
        w = jax.random.normal(next(keys), (din, dout), jnp.float32) / math.sqrt(din)
        b = jnp.zeros((dout,), jnp.float32)
        return w.astype(jnp.bfloat16), b     # matmul weights stored in bf16

    layers = []
    for _ in range(num_layers):
        wq, bq = dense(hidden_dim, hidden_dim)
        wk, bk = dense(hidden_dim, hidden_dim)
        wv, bv = dense(hidden_dim, hidden_dim)
        sa_wo, sa_bo = dense(hidden_dim, hidden_dim)
        ca_wq, ca_bq = dense(hidden_dim, hidden_dim)
        ck, cbk = dense(hidden_dim, hidden_dim)
        cv, cbv = dense(hidden_dim, hidden_dim)
        ca_wo, ca_bo = dense(hidden_dim, hidden_dim)
        w1, b1 = dense(hidden_dim, ff_dim)
        w2, b2 = dense(ff_dim, hidden_dim)
        layers.append(dict(
            sa_wqkv=jnp.concatenate([wq, wk, wv], axis=1),
            sa_bqkv=jnp.concatenate([bq, bk, bv], axis=0),
            sa_wo=sa_wo, sa_bo=sa_bo,
            ca_wq=ca_wq, ca_bq=ca_bq,
            ca_wkv=jnp.concatenate([ck, cv], axis=1),
            ca_bkv=jnp.concatenate([cbk, cbv], axis=0),
            ca_wo=ca_wo, ca_bo=ca_bo,
            w1=w1, b1=b1, w2=w2, b2=b2,
            g1=jnp.ones((hidden_dim,), jnp.float32), be1=jnp.zeros((hidden_dim,), jnp.float32),
            g2=jnp.ones((hidden_dim,), jnp.float32), be2=jnp.zeros((hidden_dim,), jnp.float32),
            g3=jnp.ones((hidden_dim,), jnp.float32), be3=jnp.zeros((hidden_dim,), jnp.float32),
        ))

    emb = jax.random.normal(next(keys), (input_dim, hidden_dim), jnp.float32)
    out_w, out_b = dense(hidden_dim, output_dim)
    return dict(embedding=emb, layers=layers, out_w=out_w, out_b=out_b)


# ---------------------------------- main ------------------------------------ #

if __name__ == "__main__":
    # Small, module-consistent shapes.
    input_dim, hidden_dim, num_heads, num_layers = 16, 32, 2, 2
    ff_dim, output_dim = 64, 16
    B, S_tgt, S_enc = 2, 8, 8

    key = jax.random.PRNGKey(0)
    k_par, k_tok, k_enc = jax.random.split(key, 3)

    params = init_params(k_par, input_dim, hidden_dim, num_heads, num_layers,
                         ff_dim, output_dim)
    tokens = jax.random.randint(k_tok, (B, S_tgt), 0, input_dim, dtype=jnp.int32)
    encoder_output = jax.random.normal(k_enc, (B, S_enc, hidden_dim), jnp.float32)

    # TODO(synk): dropout layers are identity here (eval-mode determinism).
    fwd = jax.jit(functools.partial(decoder_forward, num_heads=num_heads))
    out = fwd(params, tokens, encoder_output)
    jax.block_until_ready(out)

    assert out.shape == (B, S_tgt, output_dim)
    assert bool(jnp.all(jnp.isfinite(out)))
    print("KERNEL_OK")
</pallas_src>

<mosaic_0001>
module attributes {stable_mosaic.version = 11 : i64} {
  func.func @_matmul_split_kernel(%arg0: i32, %arg1: i32, %arg2: memref<16x32xbf16, #tpu.memory_space<vmem>>, %arg3: memref<32x96xbf16, #tpu.memory_space<vmem>>, %arg4: memref<1x96xf32, #tpu.memory_space<vmem>>, %arg5: memref<16x32xbf16, #tpu.memory_space<vmem>>, %arg6: memref<16x64xbf16, #tpu.memory_space<vmem>>, %arg7: memref<16x96xf32, #tpu.memory_space<vmem>>) attributes {dimension_semantics = [#tpu.dimension_semantics<parallel>, #tpu.dimension_semantics<arbitrary>], iteration_bounds = array<i64: 1, 1>, scalar_prefetch = 0 : i64, scratch_operands = 1 : i64, tpu.core_type = #tpu.core_type<tc>, window_params = [{transform_indices = @transform_0, window_bounds = array<i64: 16, 32>}, {transform_indices = @transform_1, window_bounds = array<i64: 32, 96>}, {pipeline_mode = #tpu.pipeline_mode<synchronous>, transform_indices = @transform_2, window_bounds = array<i64: 1, 96>}, {transform_indices = @transform_3, window_bounds = array<i64: 16, 32>}, {transform_indices = @transform_4, window_bounds = array<i64: 16, 64>}]} {
    %c0_i32 = arith.constant 0 : i32
    %0 = arith.cmpi eq, %arg1, %c0_i32 : i32
    %1 = arith.extui %0 : i1 to i32
    %c0_i32_0 = arith.constant 0 : i32
    %2 = arith.cmpi ne, %1, %c0_i32_0 : i32
    scf.if %2 {
      %cst_10 = arith.constant 0.000000e+00 : f32
      %12 = vector.broadcast %cst_10 : f32 to vector<16x96xf32>
      %c0_11 = arith.constant 0 : index
      %c0_12 = arith.constant 0 : index
      %13 = vector.load %arg7[%c0_11, %c0_12] : memref<16x96xf32, #tpu.memory_space<vmem>>, vector<16x96xf32>
      tpu.vector_store %arg7[%c0_11, %c0_12], %12 {strides = array<i32>} : memref<16x96xf32, #tpu.memory_space<vmem>>, vector<16x96xf32>,
    } else {
    }
    %c0 = arith.constant 0 : index
    %c0_1 = arith.constant 0 : index
    %3 = vector.load %arg7[%c0, %c0_1] : memref<16x96xf32, #tpu.memory_space<vmem>>, vector<16x96xf32>
    %c0_2 = arith.constant 0 : index
    %c0_3 = arith.constant 0 : index
    %4 = vector.load %arg2[%c0_2, %c0_3] : memref<16x32xbf16, #tpu.memory_space<vmem>>, vector<16x32xbf16>
    %c0_4 = arith.constant 0 : index
    %c0_5 = arith.constant 0 : index
    %5 = vector.load %arg3[%c0_4, %c0_5] : memref<32x96xbf16, #tpu.memory_space<vmem>>, vector<32x96xbf16>
    %cst = arith.constant dense<0.000000e+00> : vector<16x96xf32>
    %6 = tpu.matmul %4, %5, %cst {dimension_numbers = #tpu.dot_dimension_numbers<[1], [0], [0], [1], [0, 0, 1, 1], [], []>} : vector<16x32xbf16>, vector<32x96xbf16>, vector<16x96xf32> -> vector<16x96xf32>
    %7 = arith.addf %3, %6 : vector<16x96xf32>
    %c0_6 = arith.constant 0 : index
    %c0_7 = arith.constant 0 : index
    %8 = vector.load %arg7[%c0_6, %c0_7] : memref<16x96xf32, #tpu.memory_space<vmem>>, vector<16x96xf32>
    tpu.vector_store %arg7[%c0_6, %c0_7], %7 {strides = array<i32>} : memref<16x96xf32, #tpu.memory_space<vmem>>, vector<16x96xf32>,
    %c0_i32_8 = arith.constant 0 : i32
    %9 = arith.cmpi eq, %arg1, %c0_i32_8 : i32
    %10 = arith.extui %9 : i1 to i32
    %c0_i32_9 = arith.constant 0 : i32
    %11 = arith.cmpi ne, %10, %c0_i32_9 : i32
    scf.if %11 {
      %c0_10 = arith.constant 0 : index
      %c0_11 = arith.constant 0 : index
      %12 = vector.load %arg7[%c0_10, %c0_11] : memref<16x96xf32, #tpu.memory_space<vmem>>, vector<16x96xf32>
      %c0_12 = arith.constant 0 : index
      %c0_13 = arith.constant 0 : index
      %13 = vector.load %arg4[%c0_12, %c0_13] : memref<1x96xf32, #tpu.memory_space<vmem>>, vector<1x96xf32>
      %14 = vector.broadcast %13 : vector<1x96xf32> to vector<16x96xf32>
      %15 = arith.addf %12, %14 : vector<16x96xf32>
      %16 = vector.extract_strided_slice %15 {offsets = [0, 0], sizes = [16, 32], strides = [1, 1]} : vector<16x96xf32> to vector<16x32xf32>
      %17 = arith.truncf %16 : vector<16x32xf32> to vector<16x32xbf16>
      %c0_14 = arith.constant 0 : index
      %c0_15 = arith.constant 0 : index
      %18 = vector.load %arg5[%c0_14, %c0_15] : memref<16x32xbf16, #tpu.memory_space<vmem>>, vector<16x32xbf16>
      tpu.vector_store %arg5[%c0_14, %c0_15], %17 {strides = array<i32>} : memref<16x32xbf16, #tpu.memory_space<vmem>>, vector<16x32xbf16>,
      %19 = vector.extract_strided_slice %15 {offsets = [0, 32], sizes = [16, 64], strides = [1, 1]} : vector<16x96xf32> to vector<16x64xf32>
      %20 = arith.truncf %19 : vector<16x64xf32> to vector<16x64xbf16>
      %c0_16 = arith.constant 0 : index
      %c0_17 = arith.constant 0 : index
      %21 = vector.load %arg6[%c0_16, %c0_17] : memref<16x64xbf16, #tpu.memory_space<vmem>>, vector<16x64xbf16>
      tpu.vector_store %arg6[%c0_16, %c0_17], %20 {strides = array<i32>} : memref<16x64xbf16, #tpu.memory_space<vmem>>, vector<16x64xbf16>,
    } else {
    }
    return
  }
  func.func @transform_0(%arg0: i32, %arg1: i32) -> (i32, i32) {
    %c0_i32 = arith.constant 0 : i32
    return %arg0, %arg1 : i32, i32
  }
  func.func @transform_1(%arg0: i32, %arg1: i32) -> (i32, i32) {
    %c0_i32 = arith.constant 0 : i32
    %c0_i32_0 = arith.constant 0 : i32
    return %arg1, %c0_i32 : i32, i32
  }
  func.func @transform_2(%arg0: i32, %arg1: i32) -> (i32, i32) {
    %c0_i32 = arith.constant 0 : i32
    %c0_i32_0 = arith.constant 0 : i32
    %c0_i32_1 = arith.constant 0 : i32
    return %c0_i32, %c0_i32_0 : i32, i32
  }
  func.func @transform_3(%arg0: i32, %arg1: i32) -> (i32, i32) {
    %c0_i32 = arith.constant 0 : i32
    %c0_i32_0 = arith.constant 0 : i32
    return %arg0, %c0_i32 : i32, i32
  }
  func.func @transform_4(%arg0: i32, %arg1: i32) -> (i32, i32) {
    %c0_i32 = arith.constant 0 : i32
    %c0_i32_0 = arith.constant 0 : i32
    return %arg0, %c0_i32 : i32, i32
  }
}

module attributes {stable_mosaic.version = 11 : i64} {
  func.func @_attn_kernel(%arg0: i32, %arg1: i32, %arg2: memref<1x8x32xbf16, #tpu.memory_space<vmem>>, %arg3: memref<1x8x64xbf16, #tpu.memory_space<vmem>>, %arg4: memref<1x8x32xbf16, #tpu.memory_space<vmem>>) attributes {dimension_semantics = [#tpu.dimension_semantics<parallel>, #tpu.dimension_semantics<parallel>], iteration_bounds = array<i64: 2, 1>, scalar_prefetch = 0 : i64, scratch_operands = 0 : i64, tpu.core_type = #tpu.core_type<tc>, window_params = [{transform_indices = @transform_0, window_bounds = array<i64: 1, 8, 32>}, {transform_indices = @transform_1, window_bounds = array<i64: 1, 8, 64>}, {transform_indices = @transform_2, window_bounds = array<i64: 1, 8, 32>}]} {
    %c0 = arith.constant 0 : index
    %c0_0 = arith.constant 0 : index
    %c0_1 = arith.constant 0 : index
    %0 = vector.load %arg2[%c0, %c0_0, %c0_1] : memref<1x8x32xbf16, #tpu.memory_space<vmem>>, vector<1x8x32xbf16>
    %1 = vector.shape_cast %0 : vector<1x8x32xbf16> to vector<8x32xbf16>
    %c0_2 = arith.constant 0 : index
    %c0_3 = arith.constant 0 : index
    %c0_4 = arith.constant 0 : index
    %2 = vector.load %arg3[%c0_2, %c0_3, %c0_4] : memref<1x8x64xbf16, #tpu.memory_space<vmem>>, vector<1x8x64xbf16>
    %3 = vector.shape_cast %2 : vector<1x8x64xbf16> to vector<8x64xbf16>
    %4 = vector.extract_strided_slice %1 {offsets = [0, 0], sizes = [8, 16], strides = [1, 1]} : vector<8x32xbf16> to vector<8x16xbf16>
    %5 = vector.extract_strided_slice %3 {offsets = [0, 0], sizes = [8, 16], strides = [1, 1]} : vector<8x64xbf16> to vector<8x16xbf16>
    %6 = vector.extract_strided_slice %3 {offsets = [0, 32], sizes = [8, 16], strides = [1, 1]} : vector<8x64xbf16> to vector<8x16xbf16>
    %cst = arith.constant dense<0.000000e+00> : vector<8x8xf32>
    %7 = tpu.matmul %4, %5, %cst {dimension_numbers = #tpu.dot_dimension_numbers<[1], [1], [0], [0], [0, 0, 1, 0], [], []>} : vector<8x16xbf16>, vector<8x16xbf16>, vector<8x8xf32> -> vector<8x8xf32>
    %cst_5 = arith.constant 2.500000e-01 : f32
    %8 = vector.broadcast %cst_5 : f32 to vector<8x8xf32>
    %9 = arith.mulf %7, %8 : vector<8x8xf32>
    %cst_6 = arith.constant dense<0xFF800000> : vector<8xf32>
    %10 = vector.multi_reduction <maximumf>, %9, %cst_6 [1] : vector<8x8xf32> to vector<8xf32>
    %11 = vector.shape_cast %10 : vector<8xf32> to vector<8x1xf32>
    %12 = vector.broadcast %11 : vector<8x1xf32> to vector<8x8xf32>
    %13 = arith.subf %9, %12 : vector<8x8xf32>
    %14 = math.exp %13 : vector<8x8xf32>
    %cst_7 = arith.constant dense<0.000000e+00> : vector<8xf32>
    %15 = vector.multi_reduction <add>, %14, %cst_7 [1] : vector<8x8xf32> to vector<8xf32>
    %16 = vector.shape_cast %15 : vector<8xf32> to vector<8x1xf32>
    %17 = tpu.reciprocal %16 {approx = true} : vector<8x1xf32> -> vector<8x1xf32>
    %18 = vector.broadcast %17 : vector<8x1xf32> to vector<8x8xf32>
    %19 = arith.mulf %14, %18 : vector<8x8xf32>
    %20 = arith.truncf %19 : vector<8x8xf32> to vector<8x8xbf16>
    %cst_8 = arith.constant dense<0.000000e+00> : vector<8x16xf32>
    %21 = tpu.matmul %20, %6, %cst_8 {dimension_numbers = #tpu.dot_dimension_numbers<[1], [0], [0], [1], [0, 0, 1, 1], [], []>} : vector<8x8xbf16>, vector<8x16xbf16>, vector<8x16xf32> -> vector<8x16xf32>
    %22 = arith.truncf %21 : vector<8x16xf32> to vector<8x16xbf16>
    %c0_9 = arith.constant 0 : index
    %c0_10 = arith.constant 0 : index
    %c0_11 = arith.constant 0 : index
    %23 = vector.load %arg4[%c0_9, %c0_10, %c0_11] : memref<1x8x32xbf16, #tpu.memory_space<vmem>>, vector<1x8x16xbf16>
    %24 = vector.shape_cast %23 : vector<1x8x16xbf16> to vector<8x16xbf16>
    %25 = vector.shape_cast %22 : vector<8x16xbf16> to vector<1x8x16xbf16>
    tpu.vector_store %arg4[%c0_9, %c0_10, %c0_11], %25 {strides = array<i32>} : memref<1x8x32xbf16, #tpu.memory_space<vmem>>, vector<1x8x16xbf16>,
    %26 = vector.extract_strided_slice %1 {offsets = [0, 16], sizes = [8, 16], strides = [1, 1]} : vector<8x32xbf16> to vector<8x16xbf16>
    %27 = vector.extract_strided_slice %3 {offsets = [0, 16], sizes = [8, 16], strides = [1, 1]} : vector<8x64xbf16> to vector<8x16xbf16>
    %28 = vector.extract_strided_slice %3 {offsets = [0, 48], sizes = [8, 16], strides = [1, 1]} : vector<8x64xbf16> to vector<8x16xbf16>
    %cst_12 = arith.constant dense<0.000000e+00> : vector<8x8xf32>
    %29 = tpu.matmul %26, %27, %cst_12 {dimension_numbers = #tpu.dot_dimension_numbers<[1], [1], [0], [0], [0, 0, 1, 0], [], []>} : vector<8x16xbf16>, vector<8x16xbf16>, vector<8x8xf32> -> vector<8x8xf32>
    %cst_13 = arith.constant 2.500000e-01 : f32
    %30 = vector.broadcast %cst_13 : f32 to vector<8x8xf32>
    %31 = arith.mulf %29, %30 : vector<8x8xf32>
    %cst_14 = arith.constant dense<0xFF800000> : vector<8xf32>
    %32 = vector.multi_reduction <maximumf>, %31, %cst_14 [1] : vector<8x8xf32> to vector<8xf32>
    %33 = vector.shape_cast %32 : vector<8xf32> to vector<8x1xf32>
    %34 = vector.broadcast %33 : vector<8x1xf32> to vector<8x8xf32>
    %35 = arith.subf %31, %34 : vector<8x8xf32>
    %36 = math.exp %35 : vector<8x8xf32>
    %cst_15 = arith.constant dense<0.000000e+00> : vector<8xf32>
    %37 = vector.multi_reduction <add>, %36, %cst_15 [1] : vector<8x8xf32> to vector<8xf32>
    %38 = vector.shape_cast %37 : vector<8xf32> to vector<8x1xf32>
    %39 = tpu.reciprocal %38 {approx = true} : vector<8x1xf32> -> vector<8x1xf32>
    %40 = vector.broadcast %39 : vector<8x1xf32> to vector<8x8xf32>
    %41 = arith.mulf %36, %40 : vector<8x8xf32>
    %42 = arith.truncf %41 : vector<8x8xf32> to vector<8x8xbf16>
    %cst_16 = arith.constant dense<0.000000e+00> : vector<8x16xf32>
    %43 = tpu.matmul %42, %28, %cst_16 {dimension_numbers = #tpu.dot_dimension_numbers<[1], [0], [0], [1], [0, 0, 1, 1], [], []>} : vector<8x8xbf16>, vector<8x16xbf16>, vector<8x16xf32> -> vector<8x16xf32>
    %44 = arith.truncf %43 : vector<8x16xf32> to vector<8x16xbf16>
    %c0_17 = arith.constant 0 : index
    %c0_18 = arith.constant 0 : index
    %c16 = arith.constant 16 : index
    %45 = vector.load %arg4[%c0_17, %c0_18, %c16] : memref<1x8x32xbf16, #tpu.memory_space<vmem>>, vector<1x8x16xbf16>
    %46 = vector.shape_cast %45 : vector<1x8x16xbf16> to vector<8x16xbf16>
    %47 = vector.shape_cast %44 : vector<8x16xbf16> to vector<1x8x16xbf16>
    tpu.vector_store %arg4[%c0_17, %c0_18, %c16], %47 {strides = array<i32>} : memref<1x8x32xbf16, #tpu.memory_space<vmem>>, vector<1x8x16xbf16>,
    return
  }
  func.func @transform_0(%arg0: i32, %arg1: i32) -> (i32, i32, i32) {
    %c0_i32 = arith.constant 0 : i32
    %c0_i32_0 = arith.constant 0 : i32
    return %arg0, %arg1, %c0_i32 : i32, i32, i32
  }
  func.func @transform_1(%arg0: i32, %arg1: i32) -> (i32, i32, i32) {
    %c0_i32 = arith.constant 0 : i32
    %c0_i32_0 = arith.constant 0 : i32
    %c0_i32_1 = arith.constant 0 : i32
    return %arg0, %c0_i32, %c0_i32_0 : i32, i32, i32
  }
  func.func @transform_2(%arg0: i32, %arg1: i32) -> (i32, i32, i32) {
    %c0_i32 = arith.constant 0 : i32
    %c0_i32_0 = arith.constant 0 : i32
    return %arg0, %arg1, %c0_i32 : i32, i32, i32
  }
}

module attributes {stable_mosaic.version = 11 : i64} {
  func.func @_matmul_add_ln_kernel(%arg0: i32, %arg1: i32, %arg2: memref<16x32xbf16, #tpu.memory_space<vmem>>, %arg3: memref<32x32xbf16, #tpu.memory_space<vmem>>, %arg4: memref<1x32xf32, #tpu.memory_space<vmem>>, %arg5: memref<16x32xbf16, #tpu.memory_space<vmem>>, %arg6: memref<1x32xf32, #tpu.memory_space<vmem>>, %arg7: memref<1x32xf32, #tpu.memory_space<vmem>>, %arg8: memref<16x32xbf16, #tpu.memory_space<vmem>>, %arg9: memref<16x32xf32, #tpu.memory_space<vmem>>) attributes {dimension_semantics = [#tpu.dimension_semantics<parallel>, #tpu.dimension_semantics<arbitrary>], iteration_bounds = array<i64: 1, 1>, scalar_prefetch = 0 : i64, scratch_operands = 1 : i64, tpu.core_type = #tpu.core_type<tc>, window_params = [{transform_indices = @transform_0, window_bounds = array<i64: 16, 32>}, {transform_indices = @transform_1, window_bounds = array<i64: 32, 32>}, {pipeline_mode = #tpu.pipeline_mode<synchronous>, transform_indices = @transform_2, window_bounds = array<i64: 1, 32>}, {transform_indices = @transform_3, window_bounds = array<i64: 16, 32>}, {pipeline_mode = #tpu.pipeline_mode<synchronous>, transform_indices = @transform_4, window_bounds = array<i64: 1, 32>}, {pipeline_mode = #tpu.pipeline_mode<synchronous>, transform_indices = @transform_5, window_bounds = array<i64: 1, 32>}, {transform_indices = @transform_6, window_bounds = array<i64: 16, 32>}]} {
    %c0_i32 = arith.constant 0 : i32
    %0 = arith.cmpi eq, %arg1, %c0_i32 : i32
    %1 = arith.extui %0 : i1 to i32
    %c0_i32_0 = arith.constant 0 : i32
    %2 = arith.cmpi ne, %1, %c0_i32_0 : i32
    scf.if %2 {
      %cst_10 = arith.constant 0.000000e+00 : f32
      %12 = vector.broadcast %cst_10 : f32 to vector<16x32xf32>
      %c0_11 = arith.constant 0 : index
      %c0_12 = arith.constant 0 : index
      %13 = vector.load %arg9[%c0_11, %c0_12] : memref<16x32xf32, #tpu.memory_space<vmem>>, vector<16x32xf32>
      tpu.vector_store %arg9[%c0_11, %c0_12], %12 {strides = array<i32>} : memref<16x32xf32, #tpu.memory_space<vmem>>, vector<16x32xf32>,
    } else {
    }
    %c0 = arith.constant 0 : index
    %c0_1 = arith.constant 0 : index
    %3 = vector.load %arg9[%c0, %c0_1] : memref<16x32xf32, #tpu.memory_space<vmem>>, vector<16x32xf32>
    %c0_2 = arith.constant 0 : index
    %c0_3 = arith.constant 0 : index
    %4 = vector.load %arg2[%c0_2, %c0_3] : memref<16x32xbf16, #tpu.memory_space<vmem>>, vector<16x32xbf16>
    %c0_4 = arith.constant 0 : index
    %c0_5 = arith.constant 0 : index
    %5 = vector.load %arg3[%c0_4, %c0_5] : memref<32x32xbf16, #tpu.memory_space<vmem>>, vector<32x32xbf16>
    %cst = arith.constant dense<0.000000e+00> : vector<16x32xf32>
    %6 = tpu.matmul %4, %5, %cst {dimension_numbers = #tpu.dot_dimension_numbers<[1], [0], [0], [1], [0, 0, 1, 1], [], []>} : vector<16x32xbf16>, vector<32x32xbf16>, vector<16x32xf32> -> vector<16x32xf32>
    %7 = arith.addf %3, %6 : vector<16x32xf32>
    %c0_6 = arith.constant 0 : index
    %c0_7 = arith.constant 0 : index
    %8 = vector.load %arg9[%c0_6, %c0_7] : memref<16x32xf32, #tpu.memory_space<vmem>>, vector<16x32xf32>
    tpu.vector_store %arg9[%c0_6, %c0_7], %7 {strides = array<i32>} : memref<16x32xf32, #tpu.memory_space<vmem>>, vector<16x32xf32>,
    %c0_i32_8 = arith.constant 0 : i32
    %9 = arith.cmpi eq, %arg1, %c0_i32_8 : i32
    %10 = arith.extui %9 : i1 to i32
    %c0_i32_9 = arith.constant 0 : i32
    %11 = arith.cmpi ne, %10, %c0_i32_9 : i32
    scf.if %11 {
      %c0_10 = arith.constant 0 : index
      %c0_11 = arith.constant 0 : index
      %12 = vector.load %arg9[%c0_10, %c0_11] : memref<16x32xf32, #tpu.memory_space<vmem>>, vector<16x32xf32>
      %c0_12 = arith.constant 0 : index
      %c0_13 = arith.constant 0 : index
      %13 = vector.load %arg4[%c0_12, %c0_13] : memref<1x32xf32, #tpu.memory_space<vmem>>, vector<1x32xf32>
      %14 = vector.broadcast %13 : vector<1x32xf32> to vector<16x32xf32>
      %15 = arith.addf %12, %14 : vector<16x32xf32>
      %c0_14 = arith.constant 0 : index
      %c0_15 = arith.constant 0 : index
      %16 = vector.load %arg5[%c0_14, %c0_15] : memref<16x32xbf16, #tpu.memory_space<vmem>>, vector<16x32xbf16>
      %17 = arith.extf %16 : vector<16x32xbf16> to vector<16x32xf32>
      %18 = arith.addf %15, %17 : vector<16x32xf32>
      %cst_16 = arith.constant dense<0.000000e+00> : vector<16xf32>
      %19 = vector.multi_reduction <add>, %18, %cst_16 [1] : vector<16x32xf32> to vector<16xf32>
      %20 = vector.shape_cast %19 : vector<16xf32> to vector<16x1xf32>
      %cst_17 = arith.constant 3.200000e+01 : f32
      %21 = vector.broadcast %cst_17 : f32 to vector<16x1xf32>
      %22 = arith.divf %20, %21 : vector<16x1xf32>
      %23 = vector.broadcast %22 : vector<16x1xf32> to vector<16x32xf32>
      %24 = arith.subf %18, %23 : vector<16x32xf32>
      %25 = arith.mulf %24, %24 : vector<16x32xf32>
      %cst_18 = arith.constant dense<0.000000e+00> : vector<16xf32>
      %26 = vector.multi_reduction <add>, %25, %cst_18 [1] : vector<16x32xf32> to vector<16xf32>
      %27 = vector.shape_cast %26 : vector<16xf32> to vector<16x1xf32>
      %cst_19 = arith.constant 3.200000e+01 : f32
      %28 = vector.broadcast %cst_19 : f32 to vector<16x1xf32>
      %29 = arith.divf %27, %28 : vector<16x1xf32>
      %30 = vector.broadcast %22 : vector<16x1xf32> to vector<16x32xf32>
      %31 = arith.subf %18, %30 : vector<16x32xf32>
      %cst_20 = arith.constant 9.99999974E-6 : f32
      %32 = vector.broadcast %cst_20 : f32 to vector<16x1xf32>
      %33 = arith.addf %29, %32 : vector<16x1xf32>
      %34 = math.rsqrt %33 : vector<16x1xf32>
      %35 = vector.broadcast %34 : vector<16x1xf32> to vector<16x32xf32>
      %36 = arith.mulf %31, %35 : vector<16x32xf32>
      %c0_21 = arith.constant 0 : index
      %c0_22 = arith.constant 0 : index
      %37 = vector.load %arg6[%c0_21, %c0_22] : memref<1x32xf32, #tpu.memory_space<vmem>>, vector<1x32xf32>
      %38 = vector.broadcast %37 : vector<1x32xf32> to vector<16x32xf32>
      %39 = arith.mulf %36, %38 : vector<16x32xf32>
      %c0_23 = arith.constant 0 : index
      %c0_24 = arith.constant 0 : index
      %40 = vector.load %arg7[%c0_23, %c0_24] : memref<1x32xf32, #tpu.memory_space<vmem>>, vector<1x32xf32>
      %41 = vector.broadcast %40 : vector<1x32xf32> to vector<16x32xf32>
      %42 = arith.addf %39, %41 : vector<16x32xf32>
      %43 = arith.truncf %42 : vector<16x32xf32> to vector<16x32xbf16>
      %c0_25 = arith.constant 0 : index
      %c0_26 = arith.constant 0 : index
      %44 = vector.load %arg8[%c0_25, %c0_26] : memref<16x32xbf16, #tpu.memory_space<vmem>>, vector<16x32xbf16>
      tpu.vector_store %arg8[%c0_25, %c0_26], %43 {strides = array<i32>} : memref<16x32xbf16, #tpu.memory_space<vmem>>, vector<16x32xbf16>,
    } else {
    }
    return
  }
  func.func @transform_0(%arg0: i32, %arg1: i32) -> (i32, i32) {
    %c0_i32 = arith.constant 0 : i32
    return %arg0, %arg1 : i32, i32
  }
  func.func @transform_1(%arg0: i32, %arg1: i32) -> (i32, i32) {
    %c0_i32 = arith.constant 0 : i32
    %c0_i32_0 = arith.constant 0 : i32
    return %arg1, %c0_i32 : i32, i32
  }
  func.func @transform_2(%arg0: i32, %arg1: i32) -> (i32, i32) {
    %c0_i32 = arith.constant 0 : i32
    %c0_i32_0 = arith.constant 0 : i32
    %c0_i32_1 = arith.constant 0 : i32
    return %c0_i32, %c0_i32_0 : i32, i32
  }
  func.func @transform_3(%arg0: i32, %arg1: i32) -> (i32, i32) {
    %c0_i32 = arith.constant 0 : i32
    %c0_i32_0 = arith.constant 0 : i32
    return %arg0, %c0_i32 : i32, i32
  }
  func.func @transform_4(%arg0: i32, %arg1: i32) -> (i32, i32) {
    %c0_i32 = arith.constant 0 : i32
    %c0_i32_0 = arith.constant 0 : i32
    %c0_i32_1 = arith.constant 0 : i32
    return %c0_i32, %c0_i32_0 : i32, i32
  }
  func.func @transform_5(%arg0: i32, %arg1: i32) -> (i32, i32) {
    %c0_i32 = arith.constant 0 : i32
    %c0_i32_0 = arith.constant 0 : i32
    %c0_i32_1 = arith.constant 0 : i32
    return %c0_i32, %c0_i32_0 : i32, i32
  }
  func.func @transform_6(%arg0: i32, %arg1: i32) -> (i32, i32) {
    %c0_i32 = arith.constant 0 : i32
    %c0_i32_0 = arith.constant 0 : i32
    return %arg0, %c0_i32 : i32, i32
  }
}

module attributes {stable_mosaic.version = 11 : i64} {
  func.func @_matmul_kernel(%arg0: i32, %arg1: i32, %arg2: i32, %arg3: memref<16x32xbf16, #tpu.memory_space<vmem>>, %arg4: memref<32x64xbf16, #tpu.memory_space<vmem>>, %arg5: memref<1x64xf32, #tpu.memory_space<vmem>>, %arg6: memref<16x64xbf16, #tpu.memory_space<vmem>>, %arg7: memref<16x64xf32, #tpu.memory_space<vmem>>) attributes {dimension_semantics = [#tpu.dimension_semantics<parallel>, #tpu.dimension_semantics<parallel>, #tpu.dimension_semantics<arbitrary>], iteration_bounds = array<i64: 1, 1, 1>, scalar_prefetch = 0 : i64, scratch_operands = 1 : i64, tpu.core_type = #tpu.core_type<tc>, window_params = [{transform_indices = @transform_0, window_bounds = array<i64: 16, 32>}, {transform_indices = @transform_1, window_bounds = array<i64: 32, 64>}, {transform_indices = @transform_2, window_bounds = array<i64: 1, 64>}, {transform_indices = @transform_3, window_bounds = array<i64: 16, 64>}]} {
    %c0_i32 = arith.constant 0 : i32
    %0 = arith.cmpi eq, %arg2, %c0_i32 : i32
    %1 = arith.extui %0 : i1 to i32
    %c0_i32_0 = arith.constant 0 : i32
    %2 = arith.cmpi ne, %1, %c0_i32_0 : i32
    scf.if %2 {
      %cst_10 = arith.constant 0.000000e+00 : f32
      %12 = vector.broadcast %cst_10 : f32 to vector<16x64xf32>
      %c0_11 = arith.constant 0 : index
      %c0_12 = arith.constant 0 : index
      %13 = vector.load %arg7[%c0_11, %c0_12] : memref<16x64xf32, #tpu.memory_space<vmem>>, vector<16x64xf32>
      tpu.vector_store %arg7[%c0_11, %c0_12], %12 {strides = array<i32>} : memref<16x64xf32, #tpu.memory_space<vmem>>, vector<16x64xf32>,
    } else {
    }
    %c0 = arith.constant 0 : index
    %c0_1 = arith.constant 0 : index
    %3 = vector.load %arg7[%c0, %c0_1] : memref<16x64xf32, #tpu.memory_space<vmem>>, vector<16x64xf32>
    %c0_2 = arith.constant 0 : index
    %c0_3 = arith.constant 0 : index
    %4 = vector.load %arg3[%c0_2, %c0_3] : memref<16x32xbf16, #tpu.memory_space<vmem>>, vector<16x32xbf16>
    %c0_4 = arith.constant 0 : index
    %c0_5 = arith.constant 0 : index
    %5 = vector.load %arg4[%c0_4, %c0_5] : memref<32x64xbf16, #tpu.memory_space<vmem>>, vector<32x64xbf16>
    %cst = arith.constant dense<0.000000e+00> : vector<16x64xf32>
    %6 = tpu.matmul %4, %5, %cst {dimension_numbers = #tpu.dot_dimension_numbers<[1], [0], [0], [1], [0, 0, 1, 1], [], []>} : vector<16x32xbf16>, vector<32x64xbf16>, vector<16x64xf32> -> vector<16x64xf32>
    %7 = arith.addf %3, %6 : vector<16x64xf32>
    %c0_6 = arith.constant 0 : index
    %c0_7 = arith.constant 0 : index
    %8 = vector.load %arg7[%c0_6, %c0_7] : memref<16x64xf32, #tpu.memory_space<vmem>>, vector<16x64xf32>
    tpu.vector_store %arg7[%c0_6, %c0_7], %7 {strides = array<i32>} : memref<16x64xf32, #tpu.memory_space<vmem>>, vector<16x64xf32>,
    %c0_i32_8 = arith.constant 0 : i32
    %9 = arith.cmpi eq, %arg2, %c0_i32_8 : i32
    %10 = arith.extui %9 : i1 to i32
    %c0_i32_9 = arith.constant 0 : i32
    %11 = arith.cmpi ne, %10, %c0_i32_9 : i32
    scf.if %11 {
      %c0_10 = arith.constant 0 : index
      %c0_11 = arith.constant 0 : index
      %12 = vector.load %arg7[%c0_10, %c0_11] : memref<16x64xf32, #tpu.memory_space<vmem>>, vector<16x64xf32>
      %c0_12 = arith.constant 0 : index
      %c0_13 = arith.constant 0 : index
      %13 = vector.load %arg5[%c0_12, %c0_13] : memref<1x64xf32, #tpu.memory_space<vmem>>, vector<1x64xf32>
      %14 = vector.broadcast %13 : vector<1x64xf32> to vector<16x64xf32>
      %15 = arith.addf %12, %14 : vector<16x64xf32>
      %16 = arith.truncf %15 : vector<16x64xf32> to vector<16x64xbf16>
      %c0_14 = arith.constant 0 : index
      %c0_15 = arith.constant 0 : index
      %17 = vector.load %arg6[%c0_14, %c0_15] : memref<16x64xbf16, #tpu.memory_space<vmem>>, vector<16x64xbf16>
      tpu.vector_store %arg6[%c0_14, %c0_15], %16 {strides = array<i32>} : memref<16x64xbf16, #tpu.memory_space<vmem>>, vector<16x64xbf16>,
    } else {
    }
    return
  }
  func.func @transform_0(%arg0: i32, %arg1: i32, %arg2: i32) -> (i32, i32) {
    %c0_i32 = arith.constant 0 : i32
    return %arg0, %arg2 : i32, i32
  }
  func.func @transform_1(%arg0: i32, %arg1: i32, %arg2: i32) -> (i32, i32) {
    %c0_i32 = arith.constant 0 : i32
    return %arg2, %arg1 : i32, i32
  }
  func.func @transform_2(%arg0: i32, %arg1: i32, %arg2: i32) -> (i32, i32) {
    %c0_i32 = arith.constant 0 : i32
    %c0_i32_0 = arith.constant 0 : i32
    return %c0_i32, %arg1 : i32, i32
  }
  func.func @transform_3(%arg0: i32, %arg1: i32, %arg2: i32) -> (i32, i32) {
    %c0_i32 = arith.constant 0 : i32
    return %arg0, %arg1 : i32, i32
  }
}

module attributes {stable_mosaic.version = 11 : i64} {
  func.func @_matmul_kernel(%arg0: i32, %arg1: i32, %arg2: i32, %arg3: memref<16x32xbf16, #tpu.memory_space<vmem>>, %arg4: memref<32x32xbf16, #tpu.memory_space<vmem>>, %arg5: memref<1x32xf32, #tpu.memory_space<vmem>>, %arg6: memref<16x32xbf16, #tpu.memory_space<vmem>>, %arg7: memref<16x32xf32, #tpu.memory_space<vmem>>) attributes {dimension_semantics = [#tpu.dimension_semantics<parallel>, #tpu.dimension_semantics<parallel>, #tpu.dimension_semantics<arbitrary>], iteration_bounds = array<i64: 1, 1, 1>, scalar_prefetch = 0 : i64, scratch_operands = 1 : i64, tpu.core_type = #tpu.core_type<tc>, window_params = [{transform_indices = @transform_0, window_bounds = array<i64: 16, 32>}, {transform_indices = @transform_1, window_bounds = array<i64: 32, 32>}, {transform_indices = @transform_2, window_bounds = array<i64: 1, 32>}, {transform_indices = @transform_3, window_bounds = array<i64: 16, 32>}]} {
    %c0_i32 = arith.constant 0 : i32
    %0 = arith.cmpi eq, %arg2, %c0_i32 : i32
    %1 = arith.extui %0 : i1 to i32
    %c0_i32_0 = arith.constant 0 : i32
    %2 = arith.cmpi ne, %1, %c0_i32_0 : i32
    scf.if %2 {
      %cst_10 = arith.constant 0.000000e+00 : f32
      %12 = vector.broadcast %cst_10 : f32 to vector<16x32xf32>
      %c0_11 = arith.constant 0 : index
      %c0_12 = arith.constant 0 : index
      %13 = vector.load %arg7[%c0_11, %c0_12] : memref<16x32xf32, #tpu.memory_space<vmem>>, vector<16x32xf32>
      tpu.vector_store %arg7[%c0_11, %c0_12], %12 {strides = array<i32>} : memref<16x32xf32, #tpu.memory_space<vmem>>, vector<16x32xf32>,
    } else {
    }
    %c0 = arith.constant 0 : index
    %c0_1 = arith.constant 0 : index
    %3 = vector.load %arg7[%c0, %c0_1] : memref<16x32xf32, #tpu.memory_space<vmem>>, vector<16x32xf32>
    %c0_2 = arith.constant 0 : index
    %c0_3 = arith.constant 0 : index
    %4 = vector.load %arg3[%c0_2, %c0_3] : memref<16x32xbf16, #tpu.memory_space<vmem>>, vector<16x32xbf16>
    %c0_4 = arith.constant 0 : index
    %c0_5 = arith.constant 0 : index
    %5 = vector.load %arg4[%c0_4, %c0_5] : memref<32x32xbf16, #tpu.memory_space<vmem>>, vector<32x32xbf16>
    %cst = arith.constant dense<0.000000e+00> : vector<16x32xf32>
    %6 = tpu.matmul %4, %5, %cst {dimension_numbers = #tpu.dot_dimension_numbers<[1], [0], [0], [1], [0, 0, 1, 1], [], []>} : vector<16x32xbf16>, vector<32x32xbf16>, vector<16x32xf32> -> vector<16x32xf32>
    %7 = arith.addf %3, %6 : vector<16x32xf32>
    %c0_6 = arith.constant 0 : index
    %c0_7 = arith.constant 0 : index
    %8 = vector.load %arg7[%c0_6, %c0_7] : memref<16x32xf32, #tpu.memory_space<vmem>>, vector<16x32xf32>
    tpu.vector_store %arg7[%c0_6, %c0_7], %7 {strides = array<i32>} : memref<16x32xf32, #tpu.memory_space<vmem>>, vector<16x32xf32>,
    %c0_i32_8 = arith.constant 0 : i32
    %9 = arith.cmpi eq, %arg2, %c0_i32_8 : i32
    %10 = arith.extui %9 : i1 to i32
    %c0_i32_9 = arith.constant 0 : i32
    %11 = arith.cmpi ne, %10, %c0_i32_9 : i32
    scf.if %11 {
      %c0_10 = arith.constant 0 : index
      %c0_11 = arith.constant 0 : index
      %12 = vector.load %arg7[%c0_10, %c0_11] : memref<16x32xf32, #tpu.memory_space<vmem>>, vector<16x32xf32>
      %c0_12 = arith.constant 0 : index
      %c0_13 = arith.constant 0 : index
      %13 = vector.load %arg5[%c0_12, %c0_13] : memref<1x32xf32, #tpu.memory_space<vmem>>, vector<1x32xf32>
      %14 = vector.broadcast %13 : vector<1x32xf32> to vector<16x32xf32>
      %15 = arith.addf %12, %14 : vector<16x32xf32>
      %16 = arith.truncf %15 : vector<16x32xf32> to vector<16x32xbf16>
      %c0_14 = arith.constant 0 : index
      %c0_15 = arith.constant 0 : index
      %17 = vector.load %arg6[%c0_14, %c0_15] : memref<16x32xbf16, #tpu.memory_space<vmem>>, vector<16x32xbf16>
      tpu.vector_store %arg6[%c0_14, %c0_15], %16 {strides = array<i32>} : memref<16x32xbf16, #tpu.memory_space<vmem>>, vector<16x32xbf16>,
    } else {
    }
    return
  }
  func.func @transform_0(%arg0: i32, %arg1: i32, %arg2: i32) -> (i32, i32) {
    %c0_i32 = arith.constant 0 : i32
    return %arg0, %arg2 : i32, i32
  }
  func.func @transform_1(%arg0: i32, %arg1: i32, %arg2: i32) -> (i32, i32) {
    %c0_i32 = arith.constant 0 : i32
    return %arg2, %arg1 : i32, i32
  }
  func.func @transform_2(%arg0: i32, %arg1: i32, %arg2: i32) -> (i32, i32) {
    %c0_i32 = arith.constant 0 : i32
    %c0_i32_0 = arith.constant 0 : i32
    return %c0_i32, %arg1 : i32, i32
  }
  func.func @transform_3(%arg0: i32, %arg1: i32, %arg2: i32) -> (i32, i32) {
    %c0_i32 = arith.constant 0 : i32
    return %arg0, %arg1 : i32, i32
  }
}

module attributes {stable_mosaic.version = 11 : i64} {
  func.func @_matmul_kernel(%arg0: i32, %arg1: i32, %arg2: i32, %arg3: memref<16x32xbf16, #tpu.memory_space<vmem>>, %arg4: memref<32x64xbf16, #tpu.memory_space<vmem>>, %arg5: memref<1x64xf32, #tpu.memory_space<vmem>>, %arg6: memref<16x64xbf16, #tpu.memory_space<vmem>>, %arg7: memref<16x64xf32, #tpu.memory_space<vmem>>) attributes {dimension_semantics = [#tpu.dimension_semantics<parallel>, #tpu.dimension_semantics<parallel>, #tpu.dimension_semantics<arbitrary>], iteration_bounds = array<i64: 1, 1, 1>, scalar_prefetch = 0 : i64, scratch_operands = 1 : i64, tpu.core_type = #tpu.core_type<tc>, window_params = [{transform_indices = @transform_0, window_bounds = array<i64: 16, 32>}, {transform_indices = @transform_1, window_bounds = array<i64: 32, 64>}, {transform_indices = @transform_2, window_bounds = array<i64: 1, 64>}, {transform_indices = @transform_3, window_bounds = array<i64: 16, 64>}]} {
    %c0_i32 = arith.constant 0 : i32
    %0 = arith.cmpi eq, %arg2, %c0_i32 : i32
    %1 = arith.extui %0 : i1 to i32
    %c0_i32_0 = arith.constant 0 : i32
    %2 = arith.cmpi ne, %1, %c0_i32_0 : i32
    scf.if %2 {
      %cst_10 = arith.constant 0.000000e+00 : f32
      %12 = vector.broadcast %cst_10 : f32 to vector<16x64xf32>
      %c0_11 = arith.constant 0 : index
      %c0_12 = arith.constant 0 : index
      %13 = vector.load %arg7[%c0_11, %c0_12] : memref<16x64xf32, #tpu.memory_space<vmem>>, vector<16x64xf32>
      tpu.vector_store %arg7[%c0_11, %c0_12], %12 {strides = array<i32>} : memref<16x64xf32, #tpu.memory_space<vmem>>, vector<16x64xf32>,
    } else {
    }
    %c0 = arith.constant 0 : index
    %c0_1 = arith.constant 0 : index
    %3 = vector.load %arg7[%c0, %c0_1] : memref<16x64xf32, #tpu.memory_space<vmem>>, vector<16x64xf32>
    %c0_2 = arith.constant 0 : index
    %c0_3 = arith.constant 0 : index
    %4 = vector.load %arg3[%c0_2, %c0_3] : memref<16x32xbf16, #tpu.memory_space<vmem>>, vector<16x32xbf16>
    %c0_4 = arith.constant 0 : index
    %c0_5 = arith.constant 0 : index
    %5 = vector.load %arg4[%c0_4, %c0_5] : memref<32x64xbf16, #tpu.memory_space<vmem>>, vector<32x64xbf16>
    %cst = arith.constant dense<0.000000e+00> : vector<16x64xf32>
    %6 = tpu.matmul %4, %5, %cst {dimension_numbers = #tpu.dot_dimension_numbers<[1], [0], [0], [1], [0, 0, 1, 1], [], []>} : vector<16x32xbf16>, vector<32x64xbf16>, vector<16x64xf32> -> vector<16x64xf32>
    %7 = arith.addf %3, %6 : vector<16x64xf32>
    %c0_6 = arith.constant 0 : index
    %c0_7 = arith.constant 0 : index
    %8 = vector.load %arg7[%c0_6, %c0_7] : memref<16x64xf32, #tpu.memory_space<vmem>>, vector<16x64xf32>
    tpu.vector_store %arg7[%c0_6, %c0_7], %7 {strides = array<i32>} : memref<16x64xf32, #tpu.memory_space<vmem>>, vector<16x64xf32>,
    %c0_i32_8 = arith.constant 0 : i32
    %9 = arith.cmpi eq, %arg2, %c0_i32_8 : i32
    %10 = arith.extui %9 : i1 to i32
    %c0_i32_9 = arith.constant 0 : i32
    %11 = arith.cmpi ne, %10, %c0_i32_9 : i32
    scf.if %11 {
      %c0_10 = arith.constant 0 : index
      %c0_11 = arith.constant 0 : index
      %12 = vector.load %arg7[%c0_10, %c0_11] : memref<16x64xf32, #tpu.memory_space<vmem>>, vector<16x64xf32>
      %c0_12 = arith.constant 0 : index
      %c0_13 = arith.constant 0 : index
      %13 = vector.load %arg5[%c0_12, %c0_13] : memref<1x64xf32, #tpu.memory_space<vmem>>, vector<1x64xf32>
      %14 = vector.broadcast %13 : vector<1x64xf32> to vector<16x64xf32>
      %15 = arith.addf %12, %14 : vector<16x64xf32>
      %cst_14 = arith.constant 0.000000e+00 : f32
      %16 = vector.broadcast %cst_14 : f32 to vector<16x64xf32>
      %17 = arith.maximumf %15, %16 : vector<16x64xf32>
      %18 = arith.truncf %17 : vector<16x64xf32> to vector<16x64xbf16>
      %c0_15 = arith.constant 0 : index
      %c0_16 = arith.constant 0 : index
      %19 = vector.load %arg6[%c0_15, %c0_16] : memref<16x64xbf16, #tpu.memory_space<vmem>>, vector<16x64xbf16>
      tpu.vector_store %arg6[%c0_15, %c0_16], %18 {strides = array<i32>} : memref<16x64xbf16, #tpu.memory_space<vmem>>, vector<16x64xbf16>,
    } else {
    }
    return
  }
  func.func @transform_0(%arg0: i32, %arg1: i32, %arg2: i32) -> (i32, i32) {
    %c0_i32 = arith.constant 0 : i32
    return %arg0, %arg2 : i32, i32
  }
  func.func @transform_1(%arg0: i32, %arg1: i32, %arg2: i32) -> (i32, i32) {
    %c0_i32 = arith.constant 0 : i32
    return %arg2, %arg1 : i32, i32
  }
  func.func @transform_2(%arg0: i32, %arg1: i32, %arg2: i32) -> (i32, i32) {
    %c0_i32 = arith.constant 0 : i32
    %c0_i32_0 = arith.constant 0 : i32
    return %c0_i32, %arg1 : i32, i32
  }
  func.func @transform_3(%arg0: i32, %arg1: i32, %arg2: i32) -> (i32, i32) {
    %c0_i32 = arith.constant 0 : i32
    return %arg0, %arg1 : i32, i32
  }
}

module attributes {stable_mosaic.version = 11 : i64} {
  func.func @_matmul_add_ln_kernel(%arg0: i32, %arg1: i32, %arg2: memref<16x64xbf16, #tpu.memory_space<vmem>>, %arg3: memref<64x32xbf16, #tpu.memory_space<vmem>>, %arg4: memref<1x32xf32, #tpu.memory_space<vmem>>, %arg5: memref<16x32xbf16, #tpu.memory_space<vmem>>, %arg6: memref<1x32xf32, #tpu.memory_space<vmem>>, %arg7: memref<1x32xf32, #tpu.memory_space<vmem>>, %arg8: memref<16x32xbf16, #tpu.memory_space<vmem>>, %arg9: memref<16x32xf32, #tpu.memory_space<vmem>>) attributes {dimension_semantics = [#tpu.dimension_semantics<parallel>, #tpu.dimension_semantics<arbitrary>], iteration_bounds = array<i64: 1, 1>, scalar_prefetch = 0 : i64, scratch_operands = 1 : i64, tpu.core_type = #tpu.core_type<tc>, window_params = [{transform_indices = @transform_0, window_bounds = array<i64: 16, 64>}, {transform_indices = @transform_1, window_bounds = array<i64: 64, 32>}, {pipeline_mode = #tpu.pipeline_mode<synchronous>, transform_indices = @transform_2, window_bounds = array<i64: 1, 32>}, {transform_indices = @transform_3, window_bounds = array<i64: 16, 32>}, {pipeline_mode = #tpu.pipeline_mode<synchronous>, transform_indices = @transform_4, window_bounds = array<i64: 1, 32>}, {pipeline_mode = #tpu.pipeline_mode<synchronous>, transform_indices = @transform_5, window_bounds = array<i64: 1, 32>}, {transform_indices = @transform_6, window_bounds = array<i64: 16, 32>}]} {
    %c0_i32 = arith.constant 0 : i32
    %0 = arith.cmpi eq, %arg1, %c0_i32 : i32
    %1 = arith.extui %0 : i1 to i32
    %c0_i32_0 = arith.constant 0 : i32
    %2 = arith.cmpi ne, %1, %c0_i32_0 : i32
    scf.if %2 {
      %cst_10 = arith.constant 0.000000e+00 : f32
      %12 = vector.broadcast %cst_10 : f32 to vector<16x32xf32>
      %c0_11 = arith.constant 0 : index
      %c0_12 = arith.constant 0 : index
      %13 = vector.load %arg9[%c0_11, %c0_12] : memref<16x32xf32, #tpu.memory_space<vmem>>, vector<16x32xf32>
      tpu.vector_store %arg9[%c0_11, %c0_12], %12 {strides = array<i32>} : memref<16x32xf32, #tpu.memory_space<vmem>>, vector<16x32xf32>,
    } else {
    }
    %c0 = arith.constant 0 : index
    %c0_1 = arith.constant 0 : index
    %3 = vector.load %arg9[%c0, %c0_1] : memref<16x32xf32, #tpu.memory_space<vmem>>, vector<16x32xf32>
    %c0_2 = arith.constant 0 : index
    %c0_3 = arith.constant 0 : index
    %4 = vector.load %arg2[%c0_2, %c0_3] : memref<16x64xbf16, #tpu.memory_space<vmem>>, vector<16x64xbf16>
    %c0_4 = arith.constant 0 : index
    %c0_5 = arith.constant 0 : index
    %5 = vector.load %arg3[%c0_4, %c0_5] : memref<64x32xbf16, #tpu.memory_space<vmem>>, vector<64x32xbf16>
    %cst = arith.constant dense<0.000000e+00> : vector<16x32xf32>
    %6 = tpu.matmul %4, %5, %cst {dimension_numbers = #tpu.dot_dimension_numbers<[1], [0], [0], [1], [0, 0, 1, 1], [], []>} : vector<16x64xbf16>, vector<64x32xbf16>, vector<16x32xf32> -> vector<16x32xf32>
    %7 = arith.addf %3, %6 : vector<16x32xf32>
    %c0_6 = arith.constant 0 : index
    %c0_7 = arith.constant 0 : index
    %8 = vector.load %arg9[%c0_6, %c0_7] : memref<16x32xf32, #tpu.memory_space<vmem>>, vector<16x32xf32>
    tpu.vector_store %arg9[%c0_6, %c0_7], %7 {strides = array<i32>} : memref<16x32xf32, #tpu.memory_space<vmem>>, vector<16x32xf32>,
    %c0_i32_8 = arith.constant 0 : i32
    %9 = arith.cmpi eq, %arg1, %c0_i32_8 : i32
    %10 = arith.extui %9 : i1 to i32
    %c0_i32_9 = arith.constant 0 : i32
    %11 = arith.cmpi ne, %10, %c0_i32_9 : i32
    scf.if %11 {
      %c0_10 = arith.constant 0 : index
      %c0_11 = arith.constant 0 : index
      %12 = vector.load %arg9[%c0_10, %c0_11] : memref<16x32xf32, #tpu.memory_space<vmem>>, vector<16x32xf32>
      %c0_12 = arith.constant 0 : index
      %c0_13 = arith.constant 0 : index
      %13 = vector.load %arg4[%c0_12, %c0_13] : memref<1x32xf32, #tpu.memory_space<vmem>>, vector<1x32xf32>
      %14 = vector.broadcast %13 : vector<1x32xf32> to vector<16x32xf32>
      %15 = arith.addf %12, %14 : vector<16x32xf32>
      %c0_14 = arith.constant 0 : index
      %c0_15 = arith.constant 0 : index
      %16 = vector.load %arg5[%c0_14, %c0_15] : memref<16x32xbf16, #tpu.memory_space<vmem>>, vector<16x32xbf16>
      %17 = arith.extf %16 : vector<16x32xbf16> to vector<16x32xf32>
      %18 = arith.addf %15, %17 : vector<16x32xf32>
      %cst_16 = arith.constant dense<0.000000e+00> : vector<16xf32>
      %19 = vector.multi_reduction <add>, %18, %cst_16 [1] : vector<16x32xf32> to vector<16xf32>
      %20 = vector.shape_cast %19 : vector<16xf32> to vector<16x1xf32>
      %cst_17 = arith.constant 3.200000e+01 : f32
      %21 = vector.broadcast %cst_17 : f32 to vector<16x1xf32>
      %22 = arith.divf %20, %21 : vector<16x1xf32>
      %23 = vector.broadcast %22 : vector<16x1xf32> to vector<16x32xf32>
      %24 = arith.subf %18, %23 : vector<16x32xf32>
      %25 = arith.mulf %24, %24 : vector<16x32xf32>
      %cst_18 = arith.constant dense<0.000000e+00> : vector<16xf32>
      %26 = vector.multi_reduction <add>, %25, %cst_18 [1] : vector<16x32xf32> to vector<16xf32>
      %27 = vector.shape_cast %26 : vector<16xf32> to vector<16x1xf32>
      %cst_19 = arith.constant 3.200000e+01 : f32
      %28 = vector.broadcast %cst_19 : f32 to vector<16x1xf32>
      %29 = arith.divf %27, %28 : vector<16x1xf32>
      %30 = vector.broadcast %22 : vector<16x1xf32> to vector<16x32xf32>
      %31 = arith.subf %18, %30 : vector<16x32xf32>
      %cst_20 = arith.constant 9.99999974E-6 : f32
      %32 = vector.broadcast %cst_20 : f32 to vector<16x1xf32>
      %33 = arith.addf %29, %32 : vector<16x1xf32>
      %34 = math.rsqrt %33 : vector<16x1xf32>
      %35 = vector.broadcast %34 : vector<16x1xf32> to vector<16x32xf32>
      %36 = arith.mulf %31, %35 : vector<16x32xf32>
      %c0_21 = arith.constant 0 : index
      %c0_22 = arith.constant 0 : index
      %37 = vector.load %arg6[%c0_21, %c0_22] : memref<1x32xf32, #tpu.memory_space<vmem>>, vector<1x32xf32>
      %38 = vector.broadcast %37 : vector<1x32xf32> to vector<16x32xf32>
      %39 = arith.mulf %36, %38 : vector<16x32xf32>
      %c0_23 = arith.constant 0 : index
      %c0_24 = arith.constant 0 : index
      %40 = vector.load %arg7[%c0_23, %c0_24] : memref<1x32xf32, #tpu.memory_space<vmem>>, vector<1x32xf32>
      %41 = vector.broadcast %40 : vector<1x32xf32> to vector<16x32xf32>
      %42 = arith.addf %39, %41 : vector<16x32xf32>
      %43 = arith.truncf %42 : vector<16x32xf32> to vector<16x32xbf16>
      %c0_25 = arith.constant 0 : index
      %c0_26 = arith.constant 0 : index
      %44 = vector.load %arg8[%c0_25, %c0_26] : memref<16x32xbf16, #tpu.memory_space<vmem>>, vector<16x32xbf16>
      tpu.vector_store %arg8[%c0_25, %c0_26], %43 {strides = array<i32>} : memref<16x32xbf16, #tpu.memory_space<vmem>>, vector<16x32xbf16>,
    } else {
    }
    return
  }
  func.func @transform_0(%arg0: i32, %arg1: i32) -> (i32, i32) {
    %c0_i32 = arith.constant 0 : i32
    return %arg0, %arg1 : i32, i32
  }
  func.func @transform_1(%arg0: i32, %arg1: i32) -> (i32, i32) {
    %c0_i32 = arith.constant 0 : i32
    %c0_i32_0 = arith.constant 0 : i32
    return %arg1, %c0_i32 : i32, i32
  }
  func.func @transform_2(%arg0: i32, %arg1: i32) -> (i32, i32) {
    %c0_i32 = arith.constant 0 : i32
    %c0_i32_0 = arith.constant 0 : i32
    %c0_i32_1 = arith.constant 0 : i32
    return %c0_i32, %c0_i32_0 : i32, i32
  }
  func.func @transform_3(%arg0: i32, %arg1: i32) -> (i32, i32) {
    %c0_i32 = arith.constant 0 : i32
    %c0_i32_0 = arith.constant 0 : i32
    return %arg0, %c0_i32 : i32, i32
  }
  func.func @transform_4(%arg0: i32, %arg1: i32) -> (i32, i32) {
    %c0_i32 = arith.constant 0 : i32
    %c0_i32_0 = arith.constant 0 : i32
    %c0_i32_1 = arith.constant 0 : i32
    return %c0_i32, %c0_i32_0 : i32, i32
  }
  func.func @transform_5(%arg0: i32, %arg1: i32) -> (i32, i32) {
    %c0_i32 = arith.constant 0 : i32
    %c0_i32_0 = arith.constant 0 : i32
    %c0_i32_1 = arith.constant 0 : i32
    return %c0_i32, %c0_i32_0 : i32, i32
  }
  func.func @transform_6(%arg0: i32, %arg1: i32) -> (i32, i32) {
    %c0_i32 = arith.constant 0 : i32
    %c0_i32_0 = arith.constant 0 : i32
    return %arg0, %c0_i32 : i32, i32
  }
}

module attributes {stable_mosaic.version = 11 : i64} {
  func.func @_matmul_kernel(%arg0: i32, %arg1: i32, %arg2: i32, %arg3: memref<16x32xbf16, #tpu.memory_space<vmem>>, %arg4: memref<32x16xbf16, #tpu.memory_space<vmem>>, %arg5: memref<1x16xf32, #tpu.memory_space<vmem>>, %arg6: memref<16x16xf32, #tpu.memory_space<vmem>>, %arg7: memref<16x16xf32, #tpu.memory_space<vmem>>) attributes {dimension_semantics = [#tpu.dimension_semantics<parallel>, #tpu.dimension_semantics<parallel>, #tpu.dimension_semantics<arbitrary>], iteration_bounds = array<i64: 1, 1, 1>, scalar_prefetch = 0 : i64, scratch_operands = 1 : i64, tpu.core_type = #tpu.core_type<tc>, window_params = [{transform_indices = @transform_0, window_bounds = array<i64: 16, 32>}, {transform_indices = @transform_1, window_bounds = array<i64: 32, 16>}, {transform_indices = @transform_2, window_bounds = array<i64: 1, 16>}, {transform_indices = @transform_3, window_bounds = array<i64: 16, 16>}]} {
    %c0_i32 = arith.constant 0 : i32
    %0 = arith.cmpi eq, %arg2, %c0_i32 : i32
    %1 = arith.extui %0 : i1 to i32
    %c0_i32_0 = arith.constant 0 : i32
    %2 = arith.cmpi ne, %1, %c0_i32_0 : i32
    scf.if %2 {
      %cst_10 = arith.constant 0.000000e+00 : f32
      %12 = vector.broadcast %cst_10 : f32 to vector<16x16xf32>
      %c0_11 = arith.constant 0 : index
      %c0_12 = arith.constant 0 : index
      %13 = vector.load %arg7[%c0_11, %c0_12] : memref<16x16xf32, #tpu.memory_space<vmem>>, vector<16x16xf32>
      tpu.vector_store %arg7[%c0_11, %c0_12], %12 {strides = array<i32>} : memref<16x16xf32, #tpu.memory_space<vmem>>, vector<16x16xf32>,
    } else {
    }
    %c0 = arith.constant 0 : index
    %c0_1 = arith.constant 0 : index
    %3 = vector.load %arg7[%c0, %c0_1] : memref<16x16xf32, #tpu.memory_space<vmem>>, vector<16x16xf32>
    %c0_2 = arith.constant 0 : index
    %c0_3 = arith.constant 0 : index
    %4 = vector.load %arg3[%c0_2, %c0_3] : memref<16x32xbf16, #tpu.memory_space<vmem>>, vector<16x32xbf16>
    %c0_4 = arith.constant 0 : index
    %c0_5 = arith.constant 0 : index
    %5 = vector.load %arg4[%c0_4, %c0_5] : memref<32x16xbf16, #tpu.memory_space<vmem>>, vector<32x16xbf16>
    %cst = arith.constant dense<0.000000e+00> : vector<16x16xf32>
    %6 = tpu.matmul %4, %5, %cst {dimension_numbers = #tpu.dot_dimension_numbers<[1], [0], [0], [1], [0, 0, 1, 1], [], []>} : vector<16x32xbf16>, vector<32x16xbf16>, vector<16x16xf32> -> vector<16x16xf32>
    %7 = arith.addf %3, %6 : vector<16x16xf32>
    %c0_6 = arith.constant 0 : index
    %c0_7 = arith.constant 0 : index
    %8 = vector.load %arg7[%c0_6, %c0_7] : memref<16x16xf32, #tpu.memory_space<vmem>>, vector<16x16xf32>
    tpu.vector_store %arg7[%c0_6, %c0_7], %7 {strides = array<i32>} : memref<16x16xf32, #tpu.memory_space<vmem>>, vector<16x16xf32>,
    %c0_i32_8 = arith.constant 0 : i32
    %9 = arith.cmpi eq, %arg2, %c0_i32_8 : i32
    %10 = arith.extui %9 : i1 to i32
    %c0_i32_9 = arith.constant 0 : i32
    %11 = arith.cmpi ne, %10, %c0_i32_9 : i32
    scf.if %11 {
      %c0_10 = arith.constant 0 : index
      %c0_11 = arith.constant 0 : index
      %12 = vector.load %arg7[%c0_10, %c0_11] : memref<16x16xf32, #tpu.memory_space<vmem>>, vector<16x16xf32>
      %c0_12 = arith.constant 0 : index
      %c0_13 = arith.constant 0 : index
      %13 = vector.load %arg5[%c0_12, %c0_13] : memref<1x16xf32, #tpu.memory_space<vmem>>, vector<1x16xf32>
      %14 = vector.broadcast %13 : vector<1x16xf32> to vector<16x16xf32>
      %15 = arith.addf %12, %14 : vector<16x16xf32>
      %c0_14 = arith.constant 0 : index
      %c0_15 = arith.constant 0 : index
      %16 = vector.load %arg6[%c0_14, %c0_15] : memref<16x16xf32, #tpu.memory_space<vmem>>, vector<16x16xf32>
      tpu.vector_store %arg6[%c0_14, %c0_15], %15 {strides = array<i32>} : memref<16x16xf32, #tpu.memory_space<vmem>>, vector<16x16xf32>,
    } else {
    }
    return
  }
  func.func @transform_0(%arg0: i32, %arg1: i32, %arg2: i32) -> (i32, i32) {
    %c0_i32 = arith.constant 0 : i32
    return %arg0, %arg2 : i32, i32
  }
  func.func @transform_1(%arg0: i32, %arg1: i32, %arg2: i32) -> (i32, i32) {
    %c0_i32 = arith.constant 0 : i32
    return %arg2, %arg1 : i32, i32
  }
  func.func @transform_2(%arg0: i32, %arg1: i32, %arg2: i32) -> (i32, i32) {
    %c0_i32 = arith.constant 0 : i32
    %c0_i32_0 = arith.constant 0 : i32
    return %c0_i32, %arg1 : i32, i32
  }
  func.func @transform_3(%arg0: i32, %arg1: i32, %arg2: i32) -> (i32, i32) {
    %c0_i32 = arith.constant 0 : i32
    return %arg0, %arg1 : i32, i32
  }
}

</mosaic_0001>

<bundles_post_ra>
// kernel: decoder_forward.19
= control target key start
LH: loop header
LB: loop body
LE: loop exit
PB: predicated region body
PF: predicated region fallthrough
CT: control target
= control target key end

     0   :  { %vm21_vm0 = vcmask 785408   ;;  %v167_v0 = vmov 0.0   ;;  %vm168_vm1 = vmmov 0   ;;  %vm49_vm2 = vcmask 261120   ;;  %s223_s1 = inlined_call_operand.vmem [shape: bf16[32,96], index: 1, kind: input, shape index: {}]   ;;  %s224_s0 = inlined_call_operand.vmem [shape: bf16[16,32], index: 0, kind: input, shape index: {}]   ;;  %s225_s2 = inlined_call_operand.vmem [shape: f32[1,96], index: 2, kind: input, shape index: {}]   ;;  %s226_s3 = inlined_call_operand.vmem [shape: bf16[16,32], index: 3, kind: output, shape index: {0}]   ;;  %s227_s4 = inlined_call_operand.vmem [shape: bf16[16,64], index: 4, kind: output, shape index: {1}]  }
   0x1   :  { %153 = vmatprep.subr.bf16.mxu0 %v167_v0  ;;  %v164_v1 = vld [vmem:[%s223_s1] sm:$0xff]   ;;  %157 = vmatprep.mubr.msk.bf16.mxu0 %vm168_vm1, %v167_v0  ;;  %22 = vst.msk [vmem:[#allocation2] sm:$0xff] %vm21_vm0, %v167_v0  ;;  %23 = vst.msk [vmem:[#allocation2 + $0x8] sm:$0xff] %vm21_vm0, %v167_v0  ;;  %v165_v2 = vld [vmem:[%s223_s1 + $0x8] sm:$0xff]   ;;  %vm121_vm3 = vcmask 257024   ;;  %vm130_vm4 = vcmask 519168  }
   0x2   :  { %154 = vmatpush3.bf16.msra.mxu0 %v164_v1  ;;  %v166_v3 = vld [vmem:[%s224_s0] sm:$0xff]   ;;  %s169_s0 = smov 96  }
   0x3   :  { %155 = vmatprep.subr.bf16.mxu0 %v167_v0  ;;  %v145_v12 = vld [vmem:[%s225_s2] ss:$0 sm:$0xff] }
   0x6   :  { %156 = vmatpush3.bf16.msra.mxu0 %v165_v2 }
   0x8   :  { %v24_v4 = vld [vmem:[#allocation2] sm:$0xff]  ;;  %v25_v6 = vld [vmem:[#allocation2 + $0x8] sm:$0xff] }
   0x9   :  { %158 = vmatmul.mubr.msk.bf16.vlgmr.msra.gmra.mrb[0].mxu0 %vm49_vm2, %v166_v3 }
  0xdc   :  { %v87_v5 = vpop.f32.mrb[0].mxu0 }
  0xdd   :  { %v94_v7 = vadd.f32 %v87_v5, %v24_v4  ;;  %v159_v8 = vpop.f32.mrb[1].mxu0 }
  0xde   :  { %v90_v9 = vpop.f32.mrb[2].mxu0 }
  0xdf   :  { %97 = vst.msk [vmem:[#allocation2] sm:$0xff] %vm21_vm0, %v94_v7  ;;  %v95_v10 = vadd.f32 %v90_v9, %v25_v6  ;;  %v160_v11 = vpop.f32.mrb[3].mxu0 }
  0xe1   :  { %98 = vst.msk [vmem:[#allocation2 + $0x8] sm:$0xff] %vm21_vm0, %v95_v10 }
  0xe6   :  { %v102_v13 = vld [vmem:[#allocation2] sm:$0xff] }
  0xe7   :  { %v111_v14 = vadd.f32 %v145_v12, %v102_v13 }
  0xe8   :  { %v103_v15 = vld [vmem:[#allocation2 + $0x8] sm:$0xff] }
  0xe9   :  { %v148_v16 = vpack.c.bf16 %v111_v14, %v111_v14  ;;  %v112_v17 = vadd.f32 %v145_v12, %v103_v15 }
  0xeb   :  { %124 = vrot.lane.b32.xlu0 %v148_v16, %s169_s0  ;;  %122 = vst.msk [vmem:[%s226_s3] sm:$0xf] %vm121_vm3, %v148_v16  ;;  %v149_v18 = vpack.c.bf16 %v112_v17, %v112_v17 }
  0xed   :  { %123 = vst.msk [vmem:[%s226_s3 + $0x4] sm:$0xf] %vm121_vm3, %v149_v18 }
  0xef   :  { %126 = vrot.lane.b32.xlu0 %v149_v18, %s169_s0 }
 0x15d   :  { %v125_v19 = vpop.permute.xlu0 %124 }
 0x15e   :  { %131 = vst.msk [vmem:[%s227_s4] sm:$0xf] %vm130_vm4, %v125_v19 }
 0x161   :  { %v127_v20 = vpop.permute.xlu0 %126 }
 0x162   :  { %132 = vst.msk [vmem:[%s227_s4 + $0x4] sm:$0xf] %vm130_vm4, %v127_v20 }

// kernel: decoder_forward.20
= control target key start
LH: loop header
LB: loop body
LE: loop exit
PB: predicated region body
PF: predicated region fallthrough
CT: control target
= control target key end

     0   :  { %s650_s9 = smov 0   ;;  %s652_s10 = smov 0   ;;  %s711_s0 = inlined_call_operand.vmem [shape: bf16[2,8,32], index: 0, kind: input, shape index: {}]   ;;  %s712_s1 = inlined_call_operand.vmem [shape: bf16[2,8,64], index: 1, kind: input, shape index: {}]   ;;  %s713_s2 = inlined_call_operand.vmem [shape: bf16[2,8,32], index: 2, kind: output, shape index: {}]  }
   0x1   :  { %s654_s11 = smov 0  }
   0x2 LB: > { %s24_s12 = sadd.s32 1, %s623_s10  ;;  %p519_p0 = scmp.ge.s32.totalorder %s627_s11, 1  ;;  %s627_s11 = sphi %s654_s11, %s12_s11   ;;  %s623_s10 = sphi %s652_s10, %s715_s10   ;;  %s619_s9 = sphi %s650_s9, %s714_s9  }
   0x3   : > { %p26_p1 = scmp.ge.s32.totalorder %s24_s12, 2  ;;  %p139_p2 = scmp.lt.s32.totalorder %s627_s11, 3 }
   0x5   : > { %s717_s12 = smov (%p26_p1, %s24_s12), 0  ;;  %p140_p3 = pnand %p519_p0, %p139_p2 }
   0x6   : > { %p169_p4 = scmp.lt.s32.totalorder (!%p140_p3), %s619_s9, 1  ;;  %v629_v0 = vmov (!%p140_p3), 0.0   ;;  %vm630_vm0 = vmmov (!%p140_p3), 0   ;;  %vm190_vm1 = vcmask (!%p140_p3), 130048   ;;  %vm238_vm2 = vcmask (!%p140_p3), 64512   ;;  %s631_s20 = smov (!%p140_p3), 96  }
   0x7   : > { %143 = sbr.rel (%p140_p3) target bundleno = 1424 (0x590), region = 28  ;;  %541 = vmatprep.subr.bf16.mxu0 (!%p140_p3), %v629_v0  ;;  %543 = vmatprep.mubr.msk.bf16.mxu0 (!%p140_p3), %vm630_vm0, %v629_v0  ;;  %s632_s21 = smov (!%p140_p3), 112   ;;  %vm259_vm3 = vcmask (!%p140_p3), 1043456   ;;  %vm304_vm4 = vcmask (!%p140_p3), 125952   ;;  %vm427_vm5 = vcmask (!%p140_p3), 257152  }
   0x8   : > { %547 = vmatprep.subr.bf16.mxu1 (!%p140_p3), %v629_v0  ;;  %549 = vmatprep.mubr.msk.bf16.mxu1 (!%p140_p3), %vm630_vm0, %v629_v0  ;;  %s633_s25 = smov (!%p140_p3), 80   ;;  %s634_s26 = smov (!%p140_p3), 16  }
   0xe   : > { %s719_s9 = smov (!%p169_p4, %s619_s9), 1 }
   0xf   : > { %s670_s13 = sshll.u32 %s719_s9, 2 }
  0x10   : > { %s179_s16 = scalar_lea.vmem %s712_s1, %s670_s13  ;;  %s175_s19 = scalar_lea.vmem %s711_s0, %s670_s13 }
  0x11   : > { %v189_v1 = vld [vmem:[%s179_s16] sm:$0xf]  ;;  %s694_s24 = scalar_lea.vmem %s713_s2, %s670_s13 }
  0x12   : > { %v195_v2 = vsel %vm190_vm1, %v189_v1, 0  ;;  %v188_v3 = vld [vmem:[%s175_s19] sm:$0xf]  ;;  %v524_v10 = vcombine.low %v189_v1, %v189_v1 }
  0x13   : > { %542 = vmatpush3.bf16.xpose.msra.mxu0 %v195_v2  ;;  %v526_v18 = vcombine.low %v188_v3, %v188_v3 }
  0x14   : > { %559 = vmatprep.subr.bf16.mxu0 %v629_v0  ;;  %254 = vrot.lane.b32.xlu1 %v524_v10, %s631_s20 }
  0x18   : > { %311 = vrot.lane.b32.xlu1 %v524_v10, %s632_s21 }
  0x1a   : > { %544 = vmatmul.mubr.msk.bf16.vlgmr.msra.gmra.mrb[0].mxu0 %vm190_vm1, %v188_v3 }
  0x1b   : > { %561 = vmatprep.mubr.msk.bf16.mxu0 %vm630_vm0, %v629_v0 }
  0x86   : > { %v255_v16 = vpop.permute.xlu1 %254 }
  0x87   : > { %v261_v17 = vsel %vm259_vm3, %v255_v16, 0 }
  0x88   : > { %548 = vmatpush3.bf16.msra.mxu1 %v261_v17 }
  0x89   : > { %553 = vmatprep.subr.bf16.mxu1 %v629_v0 }
  0x8a   : > { %v312_v21 = vpop.permute.xlu1 %311 }
  0x8b   : > { %v317_v23 = vsel %vm190_vm1, %v312_v21, 0 }
  0xed   : > { %v231_v4 = vpop.f32.mrb[0].mxu0 }
  0xee   : > { %v237_v5 = vmul.f32 0.25, %v231_v4  ;;  %v545_v6 = vpop.f32.mrb[1].mxu0 }
  0xef   : > { %v234_v7 = vpop.f32.mrb[2].mxu0 }
  0xf0   : > { %v546_v8 = vpop.f32.mrb[3].mxu0  ;;  %v239_v9 = vsel %vm238_vm2, %v237_v5, -inf }
  0xf1   : > { %240 = vmax.xlane.f32.xlu0 %v239_v9 }
 0x17e   : > { %v241_v11 = vpop.xlane.xlu0 %240 }
 0x17f   : > { %v242_v12 = vsub.f32 %v237_v5, %v241_v11 }
 0x181   : > { %v243_v13 = vmul.f32 1.442695, %v242_v12 }
 0x183   : > { %597 = vpow2.f32 %v243_v13 }
 0x18d   : > { %v598_v14 = vpop.eup %597 }
 0x18e   : > { %v245_v15 = vsel %vm238_vm2, %v598_v14, 0.0 }
 0x18f   : > { %246 = vadd.xlane.f32.xlu0 %v245_v15 }
 0x1a5   : > { %309 = vrot.lane.b32.xlu0 %v526_v18, %s632_s21 }
 0x21c   : > { %v247_v19 = vpop.xlane.xlu0 %246 }
 0x21d   : > { %599 = vrcp.f32 %v247_v19 }
 0x220   : > { %v310_v25 = vpop.permute.xlu0 %309 }
 0x227   : > { %v600_v20 = vpop.eup %599 }
 0x228   : > { %v249_v22 = vmul.f32 %v600_v20, %v598_v14 }
 0x22a   : > { %v250_v24 = vpack.c.bf16 %v249_v22, %v249_v22 }
 0x22c   : > { %550 = vmatmul.mubr.msk.bf16.vlgmr.msra.gmra.mrb[0].mxu1 %vm238_vm2, %v250_v24 }
 0x22d   : > { %554 = vmatpush3.bf16.xpose.msra.mxu1 %v317_v23  ;;  %555 = vmatprep.mubr.msk.bf16.mxu1 %vm630_vm0, %v629_v0 }
 0x234   : > { %556 = vmatmul.mubr.msk.bf16.vlgmr.msra.gmra.mrb[4].mxu1 %vm190_vm1, %v310_v25 }
 0x2ff   : > { %v297_v26 = vpop.f32.mrb[0].mxu1 }
 0x300   : > { %v303_v27 = vpack.c.bf16 %v297_v26, %v297_v26  ;;  %v551_v28 = vpop.f32.mrb[1].mxu1 }
 0x301   : > { %v300_v29 = vpop.f32.mrb[2].mxu1 }
 0x302   : > { %305 = vst.msk [vmem:[%s694_s24] sm:$0xf] %vm304_vm4, %v303_v27  ;;  %v552_v30 = vpop.f32.mrb[3].mxu1 }
 0x307   : > { %v353_v31 = vpop.f32.mrb[4].mxu1 }
 0x308   : > { %v359_v32 = vmul.f32 0.25, %v353_v31  ;;  %v557_v33 = vpop.f32.mrb[5].mxu1 }
 0x309   : > { %v356_v34 = vpop.f32.mrb[6].mxu1 }
 0x30a   : > { %v558_v35 = vpop.f32.mrb[7].mxu1  ;;  %v360_v36 = vsel %vm238_vm2, %v359_v32, -inf }
 0x30b   : > { %361 = vmax.xlane.f32.xlu1 %v360_v36 }
 0x31c   : > { %372 = vrot.lane.b32.xlu1 %v524_v10, %s633_s25 }
 0x398   : > { %v362_v37 = vpop.xlane.xlu1 %361 }
 0x399   : > { %v363_v38 = vsub.f32 %v359_v32, %v362_v37 }
 0x39b   : > { %v364_v39 = vmul.f32 1.442695, %v363_v38 }
 0x39c   : > { %v373_v42 = vpop.permute.xlu1 %372 }
 0x39d   : > { %601 = vpow2.f32 %v364_v39  ;;  %v378_v43 = vsel %vm259_vm3, %v373_v42, 0 }
 0x39e   : > { %560 = vmatpush3.bf16.msra.mxu0 %v378_v43 }
 0x3a7   : > { %v602_v40 = vpop.eup %601 }
 0x3a8   : > { %v366_v41 = vsel %vm238_vm2, %v602_v40, 0.0 }
 0x3a9   : > { %367 = vadd.xlane.f32.xlu0 %v366_v41 }
 0x436   : > { %v368_v44 = vpop.xlane.xlu0 %367 }
 0x437   : > { %603 = vrcp.f32 %v368_v44 }
 0x441   : > { %v604_v45 = vpop.eup %603 }
 0x442   : > { %v370_v46 = vmul.f32 %v604_v45, %v602_v40 }
 0x444   : > { %v371_v47 = vpack.c.bf16 %v370_v46, %v370_v46 }
 0x446   : > { %562 = vmatmul.mubr.msk.bf16.vlgmr.msra.gmra.mrb[4].mxu0 %vm238_vm2, %v371_v47 }
 0x519   : > { %v414_v48 = vpop.f32.mrb[4].mxu0 }
 0x51a   : > { %v532_v49 = vpack.c.bf16 %v414_v48, %v414_v48  ;;  %v563_v50 = vpop.f32.mrb[5].mxu0 }
 0x51b   : > { %v417_v51 = vpop.f32.mrb[6].mxu0 }
 0x51c   : > { %424 = vrot.lane.b32.xlu0 %v532_v49, %s634_s26  ;;  %v564_v52 = vpop.f32.mrb[7].mxu0 }
 0x58e   : > { %v425_v53 = vpop.permute.xlu0 %424 }
 0x58f   : > { %428 = vst.msk [vmem:[%s694_s24] sm:$0xf] %vm427_vm5, %v425_v53 }
 0x590 PF: > { %s12_s11 = sadd.s32 1, %s627_s11   ;;  %s714_s9 = smov %s623_s10 }
 0x591   : > { %p9_p5 = scmp.ge.s32.totalorder %s12_s11, 4   ;;  %s715_s10 = smov %s717_s12 }
 0x593   :  { %11 = sbr.rel (!%p9_p5) target bundleno = 2 (0x2), region = 61 }

// kernel: decoder_forward.21
= control target key start
LH: loop header
LB: loop body
LE: loop exit
PB: predicated region body
PF: predicated region fallthrough
CT: control target
= control target key end

     0   :  { %vm28_vm0 = vcmask 261120   ;;  %v220_v0 = vmov 0.0   ;;  %vm221_vm1 = vmmov 0   ;;  %vm178_vm2 = vcmask 257024   ;;  %s293_s1 = inlined_call_operand.vmem [shape: bf16[32,32], index: 1, kind: input, shape index: {}]   ;;  %s294_s0 = inlined_call_operand.vmem [shape: bf16[16,32], index: 0, kind: input, shape index: {}]   ;;  %s295_s3 = inlined_call_operand.vmem [shape: bf16[16,32], index: 3, kind: input, shape index: {}]   ;;  %s296_s2 = inlined_call_operand.vmem [shape: f32[1,32], index: 2, kind: input, shape index: {}]   ;;  %s297_s4 = inlined_call_operand.vmem [shape: f32[1,32], index: 4, kind: input, shape index: {}]   ;;  %s298_s5 = inlined_call_operand.vmem [shape: f32[1,32], index: 5, kind: input, shape index: {}]   ;;  %s299_s6 = inlined_call_operand.vmem [shape: bf16[16,32], index: 6, kind: output, shape index: {}]  }
   0x1   :  { %203 = vmatprep.subr.bf16.mxu0 %v220_v0  ;;  %v213_v1 = vld [vmem:[%s293_s1] sm:$0xff]   ;;  %207 = vmatprep.mubr.msk.bf16.mxu0 %vm221_vm1, %v220_v0  ;;  %29 = vst.msk [vmem:[#allocation2] sm:$0xff] %vm28_vm0, %v220_v0  ;;  %30 = vst.msk [vmem:[#allocation2 + $0x8] sm:$0xff] %vm28_vm0, %v220_v0  ;;  %v214_v2 = vld [vmem:[%s293_s1 + $0x8] sm:$0xff]  }
   0x2   :  { %204 = vmatpush3.bf16.msra.mxu0 %v213_v1  ;;  %v215_v3 = vld [vmem:[%s294_s0] sm:$0xff]  }
   0x3   :  { %205 = vmatprep.subr.bf16.mxu0 %v220_v0  ;;  %v197_v12 = vld [vmem:[%s295_s3] sm:$0xff]  }
   0x4   :  { %v189_v13 = vld [vmem:[%s296_s2] ss:$0 sm:$0xff]  ;;  %v198_v14 = vunpack.c.l.bf16 %v197_v12  ;;  %v199_v17 = vunpack.c.h.bf16 %v197_v12 }
   0x5   :  { %v190_v41 = vld [vmem:[%s297_s4] ss:$0 sm:$0xff] }
   0x6   :  { %206 = vmatpush3.bf16.msra.mxu0 %v214_v2  ;;  %v191_v43 = vld [vmem:[%s298_s5] ss:$0 sm:$0xff] }
   0x8   :  { %v31_v4 = vld [vmem:[#allocation2] sm:$0xff]  ;;  %v32_v6 = vld [vmem:[#allocation2 + $0x8] sm:$0xff] }
   0x9   :  { %208 = vmatmul.mubr.msk.bf16.vlgmr.msra.gmra.mrb[0].mxu0 %vm28_vm0, %v215_v3 }
  0xdc   :  { %v94_v5 = vpop.f32.mrb[0].mxu0 }
  0xdd   :  { %v101_v7 = vadd.f32 %v94_v5, %v31_v4  ;;  %v209_v8 = vpop.f32.mrb[1].mxu0 }
  0xde   :  { %v97_v9 = vpop.f32.mrb[2].mxu0 }
  0xdf   :  { %103 = vst.msk [vmem:[#allocation2] sm:$0xff] %vm28_vm0, %v101_v7  ;;  %v102_v10 = vadd.f32 %v97_v9, %v32_v6  ;;  %v210_v11 = vpop.f32.mrb[3].mxu0 }
  0xe1   :  { %104 = vst.msk [vmem:[#allocation2 + $0x8] sm:$0xff] %vm28_vm0, %v102_v10 }
  0xe6   :  { %v108_v15 = vld [vmem:[#allocation2] sm:$0xff] }
  0xe7   :  { %v117_v16 = vadd.f32 %v189_v13, %v108_v15 }
  0xe8   :  { %v109_v18 = vld [vmem:[#allocation2 + $0x8] sm:$0xff] }
  0xe9   :  { %v123_v19 = vadd.f32 %v198_v14, %v117_v16  ;;  %v118_v20 = vadd.f32 %v189_v13, %v109_v18 }
  0xeb   :  { %v125_v21 = vsel %vm28_vm0, %v123_v19, 0.0  ;;  %v124_v22 = vadd.f32 %v199_v17, %v118_v20 }
  0xec   :  { %126 = vadd.xlane.f32.xlu0 %v125_v21 }
  0xed   :  { %v128_v23 = vsel %vm28_vm0, %v124_v22, 0.0 }
  0xf0   :  { %129 = vadd.xlane.f32.xlu0 %v128_v23 }
 0x179   :  { %v127_v24 = vpop.xlane.xlu0 %126 }
 0x17a   :  { %v132_v25 = vmul.f32 0.03125, %v127_v24 }
 0x17c   :  { %v134_v26 = vsub.f32 %v123_v19, %v132_v25 }
 0x17d   :  { %v130_v27 = vpop.xlane.xlu0 %129 }
 0x17e   :  { %v133_v28 = vmul.f32 0.03125, %v130_v27  ;;  %v136_v29 = vmul.f32 %v134_v26, %v134_v26 }
 0x180   :  { %v135_v30 = vsub.f32 %v124_v22, %v133_v28  ;;  %v138_v31 = vsel %vm28_vm0, %v136_v29, 0.0 }
 0x181   :  { %139 = vadd.xlane.f32.xlu1 %v138_v31 }
 0x182   :  { %v137_v32 = vmul.f32 %v135_v30, %v135_v30 }
 0x184   :  { %v141_v33 = vsel %vm28_vm0, %v137_v32, 0.0 }
 0x185   :  { %142 = vadd.xlane.f32.xlu1 %v141_v33 }
 0x20e   :  { %v140_v34 = vpop.xlane.xlu1 %139 }
 0x20f   :  { %v144_v35 = vmul.f32 0.03125, %v140_v34 }
 0x211   :  { %v146_v36 = vadd.f32 1e-05, %v144_v35 }
 0x212   :  { %v143_v37 = vpop.xlane.xlu1 %142 }
 0x213   :  { %216 = vrsqrt.f32 %v146_v36  ;;  %v145_v38 = vmul.f32 0.03125, %v143_v37 }
 0x215   :  { %v147_v39 = vadd.f32 1e-05, %v145_v38 }
 0x217   :  { %218 = vrsqrt.f32 %v147_v39 }
 0x21d   :  { %v217_v40 = vpop.eup %216 }
 0x21e   :  { %v150_v42 = vmul.f32 %v217_v40, %v134_v26 }
 0x220   :  { %v159_v44 = vmul.f32 %v190_v41, %v150_v42 }
 0x221   :  { %v219_v45 = vpop.eup %218 }
 0x222   :  { %v168_v46 = vadd.f32 %v191_v43, %v159_v44  ;;  %v151_v47 = vmul.f32 %v219_v45, %v135_v30 }
 0x224   :  { %v194_v48 = vpack.c.bf16 %v168_v46, %v168_v46  ;;  %v160_v49 = vmul.f32 %v190_v41, %v151_v47 }
 0x226   :  { %179 = vst.msk [vmem:[%s299_s6] sm:$0xf] %vm178_vm2, %v194_v48  ;;  %v169_v50 = vadd.f32 %v191_v43, %v160_v49 }
 0x228   :  { %v195_v51 = vpack.c.bf16 %v169_v50, %v169_v50 }
 0x22a   :  { %180 = vst.msk [vmem:[%s299_s6 + $0x4] sm:$0xf] %vm178_vm2, %v195_v51 }

// kernel: decoder_forward.23
= control target key start
LH: loop header
LB: loop body
LE: loop exit
PB: predicated region body
PF: predicated region fallthrough
CT: control target
= control target key end

     0   :  { %vm19_vm0 = vcmask 523264   ;;  %v151_v0 = vmov 0.0   ;;  %vm152_vm1 = vmmov 0   ;;  %vm47_vm2 = vcmask 261120   ;;  %s195_s1 = inlined_call_operand.vmem [shape: bf16[32,64], index: 1, kind: input, shape index: {}]   ;;  %s196_s0 = inlined_call_operand.vmem [shape: bf16[16,32], index: 0, kind: input, shape index: {}]   ;;  %s197_s2 = inlined_call_operand.vmem [shape: f32[1,64], index: 2, kind: input, shape index: {}]   ;;  %s198_s3 = inlined_call_operand.vmem [shape: bf16[16,64], index: 3, kind: output, shape index: {}]  }
   0x1   :  { %138 = vmatprep.subr.bf16.mxu0 %v151_v0  ;;  %v148_v1 = vld [vmem:[%s195_s1] sm:$0xff]   ;;  %142 = vmatprep.mubr.msk.bf16.mxu0 %vm152_vm1, %v151_v0  ;;  %20 = vst.msk [vmem:[#allocation2] sm:$0xff] %vm19_vm0, %v151_v0  ;;  %21 = vst.msk [vmem:[#allocation2 + $0x8] sm:$0xff] %vm19_vm0, %v151_v0  ;;  %v149_v2 = vld [vmem:[%s195_s1 + $0x8] sm:$0xff]   ;;  %vm119_vm3 = vcmask 519168  }
   0x2   :  { %139 = vmatpush3.bf16.msra.mxu0 %v148_v1  ;;  %v150_v3 = vld [vmem:[%s196_s0] sm:$0xff]  }
   0x3   :  { %140 = vmatprep.subr.bf16.mxu0 %v151_v0  ;;  %v130_v12 = vld [vmem:[%s197_s2] ss:$0 sm:$0xff] }
   0x6   :  { %141 = vmatpush3.bf16.msra.mxu0 %v149_v2 }
   0x8   :  { %v22_v4 = vld [vmem:[#allocation2] sm:$0xff]  ;;  %v23_v6 = vld [vmem:[#allocation2 + $0x8] sm:$0xff] }
   0x9   :  { %143 = vmatmul.mubr.msk.bf16.vlgmr.msra.gmra.mrb[0].mxu0 %vm47_vm2, %v150_v3 }
  0xdc   :  { %v85_v5 = vpop.f32.mrb[0].mxu0 }
  0xdd   :  { %v92_v7 = vadd.f32 %v85_v5, %v22_v4  ;;  %v144_v8 = vpop.f32.mrb[1].mxu0 }
  0xde   :  { %v88_v9 = vpop.f32.mrb[2].mxu0 }
  0xdf   :  { %95 = vst.msk [vmem:[#allocation2] sm:$0xff] %vm19_vm0, %v92_v7  ;;  %v93_v10 = vadd.f32 %v88_v9, %v23_v6  ;;  %v145_v11 = vpop.f32.mrb[3].mxu0 }
  0xe1   :  { %96 = vst.msk [vmem:[#allocation2 + $0x8] sm:$0xff] %vm19_vm0, %v93_v10 }
  0xe6   :  { %v100_v13 = vld [vmem:[#allocation2] sm:$0xff] }
  0xe7   :  { %v109_v14 = vadd.f32 %v130_v12, %v100_v13 }
  0xe8   :  { %v101_v15 = vld [vmem:[#allocation2 + $0x8] sm:$0xff] }
  0xe9   :  { %v133_v16 = vpack.c.bf16 %v109_v14, %v109_v14  ;;  %v110_v17 = vadd.f32 %v130_v12, %v101_v15 }
  0xeb   :  { %120 = vst.msk [vmem:[%s198_s3] sm:$0xf] %vm119_vm3, %v133_v16  ;;  %v134_v18 = vpack.c.bf16 %v110_v17, %v110_v17 }
  0xed   :  { %121 = vst.msk [vmem:[%s198_s3 + $0x4] sm:$0xf] %vm119_vm3, %v134_v18 }

// kernel: decoder_forward.22
= control target key start
LH: loop header
LB: loop body
LE: loop exit
PB: predicated region body
PF: predicated region fallthrough
CT: control target
= control target key end

     0   :  { %vm19_vm0 = vcmask 261120   ;;  %v150_v0 = vmov 0.0   ;;  %vm151_vm1 = vmmov 0   ;;  %vm118_vm2 = vcmask 257024   ;;  %s195_s1 = inlined_call_operand.vmem [shape: bf16[32,32], index: 1, kind: input, shape index: {}]   ;;  %s196_s0 = inlined_call_operand.vmem [shape: bf16[16,32], index: 0, kind: input, shape index: {}]   ;;  %s197_s2 = inlined_call_operand.vmem [shape: f32[1,32], index: 2, kind: input, shape index: {}]   ;;  %s198_s3 = inlined_call_operand.vmem [shape: bf16[16,32], index: 3, kind: output, shape index: {}]  }
   0x1   :  { %137 = vmatprep.subr.bf16.mxu0 %v150_v0  ;;  %v147_v1 = vld [vmem:[%s195_s1] sm:$0xff]   ;;  %141 = vmatprep.mubr.msk.bf16.mxu0 %vm151_vm1, %v150_v0  ;;  %20 = vst.msk [vmem:[#allocation2] sm:$0xff] %vm19_vm0, %v150_v0  ;;  %21 = vst.msk [vmem:[#allocation2 + $0x8] sm:$0xff] %vm19_vm0, %v150_v0  ;;  %v148_v2 = vld [vmem:[%s195_s1 + $0x8] sm:$0xff]  }
   0x2   :  { %138 = vmatpush3.bf16.msra.mxu0 %v147_v1  ;;  %v149_v3 = vld [vmem:[%s196_s0] sm:$0xff]  }
   0x3   :  { %139 = vmatprep.subr.bf16.mxu0 %v150_v0  ;;  %v129_v12 = vld [vmem:[%s197_s2] ss:$0 sm:$0xff] }
   0x6   :  { %140 = vmatpush3.bf16.msra.mxu0 %v148_v2 }
   0x8   :  { %v22_v4 = vld [vmem:[#allocation2] sm:$0xff]  ;;  %v23_v6 = vld [vmem:[#allocation2 + $0x8] sm:$0xff] }
   0x9   :  { %142 = vmatmul.mubr.msk.bf16.vlgmr.msra.gmra.mrb[0].mxu0 %vm19_vm0, %v149_v3 }
  0xdc   :  { %v85_v5 = vpop.f32.mrb[0].mxu0 }
  0xdd   :  { %v92_v7 = vadd.f32 %v85_v5, %v22_v4  ;;  %v143_v8 = vpop.f32.mrb[1].mxu0 }
  0xde   :  { %v88_v9 = vpop.f32.mrb[2].mxu0 }
  0xdf   :  { %94 = vst.msk [vmem:[#allocation2] sm:$0xff] %vm19_vm0, %v92_v7  ;;  %v93_v10 = vadd.f32 %v88_v9, %v23_v6  ;;  %v144_v11 = vpop.f32.mrb[3].mxu0 }
  0xe1   :  { %95 = vst.msk [vmem:[#allocation2 + $0x8] sm:$0xff] %vm19_vm0, %v93_v10 }
  0xe6   :  { %v99_v13 = vld [vmem:[#allocation2] sm:$0xff] }
  0xe7   :  { %v108_v14 = vadd.f32 %v129_v12, %v99_v13 }
  0xe8   :  { %v100_v15 = vld [vmem:[#allocation2 + $0x8] sm:$0xff] }
  0xe9   :  { %v132_v16 = vpack.c.bf16 %v108_v14, %v108_v14  ;;  %v109_v17 = vadd.f32 %v129_v12, %v100_v15 }
  0xeb   :  { %119 = vst.msk [vmem:[%s198_s3] sm:$0xf] %vm118_vm2, %v132_v16  ;;  %v133_v18 = vpack.c.bf16 %v109_v17, %v109_v17 }
  0xed   :  { %120 = vst.msk [vmem:[%s198_s3 + $0x4] sm:$0xf] %vm118_vm2, %v133_v18 }

// kernel: decoder_forward.26
= control target key start
LH: loop header
LB: loop body
LE: loop exit
PB: predicated region body
PF: predicated region fallthrough
CT: control target
= control target key end

     0   :  { %vm19_vm0 = vcmask 523264   ;;  %v153_v0 = vmov 0.0   ;;  %vm154_vm1 = vmmov 0   ;;  %vm47_vm2 = vcmask 261120   ;;  %s197_s1 = inlined_call_operand.vmem [shape: bf16[32,64], index: 1, kind: input, shape index: {}]   ;;  %s198_s0 = inlined_call_operand.vmem [shape: bf16[16,32], index: 0, kind: input, shape index: {}]   ;;  %s199_s2 = inlined_call_operand.vmem [shape: f32[1,64], index: 2, kind: input, shape index: {}]   ;;  %s200_s3 = inlined_call_operand.vmem [shape: bf16[16,64], index: 3, kind: output, shape index: {}]  }
   0x1   :  { %140 = vmatprep.subr.bf16.mxu0 %v153_v0  ;;  %v150_v1 = vld [vmem:[%s197_s1] sm:$0xff]   ;;  %144 = vmatprep.mubr.msk.bf16.mxu0 %vm154_vm1, %v153_v0  ;;  %20 = vst.msk [vmem:[#allocation2] sm:$0xff] %vm19_vm0, %v153_v0  ;;  %21 = vst.msk [vmem:[#allocation2 + $0x8] sm:$0xff] %vm19_vm0, %v153_v0  ;;  %v151_v2 = vld [vmem:[%s197_s1 + $0x8] sm:$0xff]   ;;  %vm121_vm3 = vcmask 519168  }
   0x2   :  { %141 = vmatpush3.bf16.msra.mxu0 %v150_v1  ;;  %v152_v3 = vld [vmem:[%s198_s0] sm:$0xff]  }
   0x3   :  { %142 = vmatprep.subr.bf16.mxu0 %v153_v0  ;;  %v132_v12 = vld [vmem:[%s199_s2] ss:$0 sm:$0xff] }
   0x6   :  { %143 = vmatpush3.bf16.msra.mxu0 %v151_v2 }
   0x8   :  { %v22_v4 = vld [vmem:[#allocation2] sm:$0xff]  ;;  %v23_v6 = vld [vmem:[#allocation2 + $0x8] sm:$0xff] }
   0x9   :  { %145 = vmatmul.mubr.msk.bf16.vlgmr.msra.gmra.mrb[0].mxu0 %vm47_vm2, %v152_v3 }
  0xdc   :  { %v85_v5 = vpop.f32.mrb[0].mxu0 }
  0xdd   :  { %v92_v7 = vadd.f32 %v85_v5, %v22_v4  ;;  %v146_v8 = vpop.f32.mrb[1].mxu0 }
  0xde   :  { %v88_v9 = vpop.f32.mrb[2].mxu0 }
  0xdf   :  { %95 = vst.msk [vmem:[#allocation2] sm:$0xff] %vm19_vm0, %v92_v7  ;;  %v93_v10 = vadd.f32 %v88_v9, %v23_v6  ;;  %v147_v11 = vpop.f32.mrb[3].mxu0 }
  0xe1   :  { %96 = vst.msk [vmem:[#allocation2 + $0x8] sm:$0xff] %vm19_vm0, %v93_v10 }
  0xe6   :  { %v100_v13 = vld [vmem:[#allocation2] sm:$0xff] }
  0xe7   :  { %v109_v14 = vadd.f32 %v132_v12, %v100_v13 }
  0xe8   :  { %v101_v15 = vld [vmem:[#allocation2 + $0x8] sm:$0xff] }
  0xe9   :  { %v111_v16 = vmax.f32 %v109_v14, 0.0  ;;  %v110_v17 = vadd.f32 %v132_v12, %v101_v15 }
  0xeb   :  { %v135_v18 = vpack.c.bf16 %v111_v16, %v111_v16  ;;  %v112_v19 = vmax.f32 %v110_v17, 0.0 }
  0xed   :  { %122 = vst.msk [vmem:[%s200_s3] sm:$0xf] %vm121_vm3, %v135_v18  ;;  %v136_v20 = vpack.c.bf16 %v112_v19, %v112_v19 }
  0xef   :  { %123 = vst.msk [vmem:[%s200_s3 + $0x4] sm:$0xf] %vm121_vm3, %v136_v20 }

// kernel: decoder_forward.37
= control target key start
LH: loop header
LB: loop body
LE: loop exit
PB: predicated region body
PF: predicated region fallthrough
CT: control target
= control target key end

     0   :  { %v178_v1 = vmov 0.0   ;;  %vm179_vm0 = vmmov 0   ;;  %vm20_vm1 = vcmask 130048   ;;  %s233_s0 = inlined_call_operand.vmem [shape: bf16[16,32], index: 0, kind: input, shape index: {}]   ;;  %s234_s1 = inlined_call_operand.vmem [shape: bf16[32,16], index: 1, kind: input, shape index: {}]   ;;  %s235_s2 = inlined_call_operand.vmem [shape: f32[1,16], index: 2, kind: input, shape index: {}]   ;;  %s236_s3 = inlined_call_operand.hbm [shape: f32[16,16], index: 3, kind: output, shape index: {}]  }
   0x1   :  { %v151_v0 = vld [vmem:[%s234_s1] sm:$0xff]   ;;  %138 = vmatprep.subr.bf16.mxu0 %v178_v1  ;;  %v152_v2 = vld [vmem:[%s234_s1 + $0x8] sm:$0xff]   ;;  %142 = vmatprep.mubr.msk.bf16.mxu0 %vm179_vm0, %v178_v1 }
   0x2   :  { %139 = vmatpush3.bf16.msra.mxu0 %v151_v0 }
   0x3   :  { %140 = vmatprep.subr.bf16.mxu0 %v178_v1 }
   0x4   :  { %8 = vsyncpa [#allocation4], 0  ;;  %21 = vst.msk [vmem:[#allocation2] sm:$0xff] %vm20_vm1, %v178_v1  ;;  %v153_v3 = vld [vmem:[%s233_s0] sm:$0xff]   ;;  %vm48_vm2 = vcmask 261120   ;;  %s180_s0 = smov [#allocation3]  }
   0x5   :  { %22 = vst.msk [vmem:[#allocation2 + $0x8] sm:$0xff] %vm20_vm1, %v178_v1  ;;  %v134_v12 = vld [vmem:[%s235_s2] ss:$0 sm:$0xff]  ;;  %s119_s19 = sshll.u32 %s180_s0, 4  ;;  %s120_s19 = int_to_ptr.vmem [resolvable:$true] %s119_s19 }
   0x6   :  { %141 = vmatpush3.bf16.msra.mxu0 %v152_v2  ;;  %s154_s20 = scalar_lea.vmem %s120_s19, 256  ;;  %p159_p1 = scmp.lt.s32.totalorder %s120_s19, %s120_s19 }
   0x7   :  { %p155_p0 = scmp.ne.s32.totalorder %s120_s19, %s154_s20  ;;  %p160_p2 = scmp.lt.s32.totalorder %s154_s20, %s154_s20 }
   0x9   :  { %143 = vmatmul.mubr.msk.bf16.vlgmr.msra.gmra.mrb[0].mxu0 %vm48_vm2, %v153_v3  ;;  %p161_p3 = por %p160_p2, %p159_p1 }
   0xb   :  { %v23_v4 = vld [vmem:[#allocation2] sm:$0xff]  ;;  %p162_p4 = pnand %p161_p3, %p155_p0 }
   0xc   :  { %v24_v6 = vld [vmem:[#allocation2 + $0x8] sm:$0xff] }
  0xdc   :  { %v86_v5 = vpop.f32.mrb[0].mxu0 }
  0xdd   :  { %v93_v7 = vadd.f32 %v86_v5, %v23_v4  ;;  %v144_v8 = vpop.f32.mrb[1].mxu0 }
  0xde   :  { %v89_v9 = vpop.f32.mrb[2].mxu0 }
  0xdf   :  { %96 = vst.msk [vmem:[#allocation2] sm:$0xff] %vm20_vm1, %v93_v7  ;;  %v94_v10 = vadd.f32 %v89_v9, %v24_v6  ;;  %v145_v11 = vpop.f32.mrb[3].mxu0 }
  0xe1   :  { %97 = vst.msk [vmem:[#allocation2 + $0x8] sm:$0xff] %vm20_vm1, %v94_v10 }
  0xe6   :  { %v101_v13 = vld [vmem:[#allocation2] sm:$0xff] }
  0xe7   :  { %v110_v14 = vadd.f32 %v134_v12, %v101_v13 }
  0xe8   :  { %v102_v15 = vld [vmem:[#allocation2 + $0x8] sm:$0xff] }
  0xe9   :  { %v111_v16 = vadd.f32 %v134_v12, %v102_v15  ;;  %112 = vst.msk [vmem:[#allocation3] sm:$0xff] %vm20_vm1, %v110_v14 }
  0xeb   :  { %113 = vst.msk [vmem:[#allocation3 + $0x8] sm:$0xff] %vm20_vm1, %v111_v16 }
  0xec   :  { %165 = shalt.err (!%p162_p4)
}
  0xed   :  { %s166_s22 = scalar_lea.hbm %s236_s3, 256 }
  0xee   :  { %p167_p5 = scmp.ne.s32.totalorder %s236_s3, %s166_s22  ;;  %p170_p6 = scmp.lt.u32.totalorder %s166_s22, %s236_s3 }
  0xf0   :  { %p172_p7 = pnand %p170_p6, %p167_p5 }
  0xf2   :  { %175 = shalt.err (!%p172_p7)
}
  0xf3   :  { %s181_s27 = smov 128   ;;  %s182_s28 = smov 8  }
  0xf4   :  { %125 = dma.vmem_to_hbm [thread:$0]  %s120_s19, 256, %s236_s3, [#allocation4], %s181_s27, %s181_s27, %s182_s28  }
  0xf5   :  { %176 = dma.done.wait [#allocation4], 256  }
  0xf6   :  { %177 = vsyncadd [#allocation4], 4294967040 }
  0xf7   :  { %129 = vsyncpa [#allocation4], 1 }

// kernel: decoder_forward.27
= control target key start
LH: loop header
LB: loop body
LE: loop exit
PB: predicated region body
PF: predicated region fallthrough
CT: control target
= control target key end

     0   :  { %vm28_vm0 = vcmask 261120   ;;  %v247_v0 = vmov 0.0   ;;  %vm248_vm1 = vmmov 0   ;;  %vm72_vm2 = vcmask 523264   ;;  %s325_s1 = inlined_call_operand.vmem [shape: bf16[64,32], index: 1, kind: input, shape index: {}]   ;;  %s326_s0 = inlined_call_operand.vmem [shape: bf16[16,64], index: 0, kind: input, shape index: {}]   ;;  %s327_s3 = inlined_call_operand.vmem [shape: bf16[16,32], index: 3, kind: input, shape index: {}]   ;;  %s328_s2 = inlined_call_operand.vmem [shape: f32[1,32], index: 2, kind: input, shape index: {}]   ;;  %s329_s4 = inlined_call_operand.vmem [shape: f32[1,32], index: 4, kind: input, shape index: {}]   ;;  %s330_s5 = inlined_call_operand.vmem [shape: f32[1,32], index: 5, kind: input, shape index: {}]   ;;  %s331_s6 = inlined_call_operand.vmem [shape: bf16[16,32], index: 6, kind: output, shape index: {}]  }
   0x1   :  { %224 = vmatprep.subr.bf16.mxu0 %v247_v0  ;;  %v238_v1 = vld [vmem:[%s325_s1] sm:$0xff]   ;;  %232 = vmatprep.mubr.msk.bf16.mxu0 %vm248_vm1, %v247_v0  ;;  %29 = vst.msk [vmem:[#allocation2] sm:$0xff] %vm28_vm0, %v247_v0  ;;  %30 = vst.msk [vmem:[#allocation2 + $0x8] sm:$0xff] %vm28_vm0, %v247_v0  ;;  %v239_v2 = vld [vmem:[%s325_s1 + $0x8] sm:$0xff]   ;;  %vm195_vm3 = vcmask 257024  }
   0x2   :  { %225 = vmatpush3.bf16.msra.mxu0 %v238_v1  ;;  %v240_v3 = vld [vmem:[%s325_s1 + $0x10] sm:$0xff]   ;;  %v241_v4 = vld [vmem:[%s325_s1 + $0x18] sm:$0xff]   ;;  %v242_v5 = vld [vmem:[%s326_s0] sm:$0xff]  }
   0x3   :  { %226 = vmatprep.subr.bf16.mxu0 %v247_v0  ;;  %v216_v14 = vld [vmem:[%s327_s3] sm:$0xff]  }
   0x4   :  { %v208_v15 = vld [vmem:[%s328_s2] ss:$0 sm:$0xff]  ;;  %v217_v16 = vunpack.c.l.bf16 %v216_v14  ;;  %v218_v19 = vunpack.c.h.bf16 %v216_v14 }
   0x5   :  { %v209_v43 = vld [vmem:[%s329_s4] ss:$0 sm:$0xff] }
   0x6   :  { %227 = vmatpush3.bf16.msra.mxu0 %v239_v2  ;;  %v210_v45 = vld [vmem:[%s330_s5] ss:$0 sm:$0xff] }
   0x7   :  { %228 = vmatprep.subr.bf16.mxu0 %v247_v0 }
   0x8   :  { %v31_v6 = vld [vmem:[#allocation2] sm:$0xff]  ;;  %v32_v8 = vld [vmem:[#allocation2 + $0x8] sm:$0xff] }
   0xa   :  { %229 = vmatpush3.bf16.msra.mxu0 %v240_v3 }
   0xb   :  { %230 = vmatprep.subr.bf16.mxu0 %v247_v0 }
   0xe   :  { %231 = vmatpush3.bf16.msra.mxu0 %v241_v4 }
  0x11   :  { %233 = vmatmul.mubr.msk.bf16.vlgmr.msra.gmra.mrb[0].mxu0 %vm72_vm2, %v242_v5 }
  0xe4   :  { %v110_v7 = vpop.f32.mrb[0].mxu0 }
  0xe5   :  { %v117_v9 = vadd.f32 %v110_v7, %v31_v6  ;;  %v234_v10 = vpop.f32.mrb[1].mxu0 }
  0xe6   :  { %v113_v11 = vpop.f32.mrb[2].mxu0 }
  0xe7   :  { %120 = vst.msk [vmem:[#allocation2] sm:$0xff] %vm28_vm0, %v117_v9  ;;  %v118_v12 = vadd.f32 %v113_v11, %v32_v8  ;;  %v235_v13 = vpop.f32.mrb[3].mxu0 }
  0xe9   :  { %121 = vst.msk [vmem:[#allocation2 + $0x8] sm:$0xff] %vm28_vm0, %v118_v12 }
  0xee   :  { %v125_v17 = vld [vmem:[#allocation2] sm:$0xff] }
  0xef   :  { %v134_v18 = vadd.f32 %v208_v15, %v125_v17 }
  0xf0   :  { %v126_v20 = vld [vmem:[#allocation2 + $0x8] sm:$0xff] }
  0xf1   :  { %v140_v21 = vadd.f32 %v217_v16, %v134_v18  ;;  %v135_v22 = vadd.f32 %v208_v15, %v126_v20 }
  0xf3   :  { %v142_v23 = vsel %vm28_vm0, %v140_v21, 0.0  ;;  %v141_v24 = vadd.f32 %v218_v19, %v135_v22 }
  0xf4   :  { %143 = vadd.xlane.f32.xlu0 %v142_v23 }
  0xf5   :  { %v145_v25 = vsel %vm28_vm0, %v141_v24, 0.0 }
  0xf8   :  { %146 = vadd.xlane.f32.xlu0 %v145_v25 }
 0x181   :  { %v144_v26 = vpop.xlane.xlu0 %143 }
 0x182   :  { %v149_v27 = vmul.f32 0.03125, %v144_v26 }
 0x184   :  { %v151_v28 = vsub.f32 %v140_v21, %v149_v27 }
 0x185   :  { %v147_v29 = vpop.xlane.xlu0 %146 }
 0x186   :  { %v150_v30 = vmul.f32 0.03125, %v147_v29  ;;  %v153_v31 = vmul.f32 %v151_v28, %v151_v28 }
 0x188   :  { %v152_v32 = vsub.f32 %v141_v24, %v150_v30  ;;  %v155_v33 = vsel %vm28_vm0, %v153_v31, 0.0 }
 0x189   :  { %156 = vadd.xlane.f32.xlu1 %v155_v33 }
 0x18a   :  { %v154_v34 = vmul.f32 %v152_v32, %v152_v32 }
 0x18c   :  { %v158_v35 = vsel %vm28_vm0, %v154_v34, 0.0 }
 0x18d   :  { %159 = vadd.xlane.f32.xlu1 %v158_v35 }
 0x216   :  { %v157_v36 = vpop.xlane.xlu1 %156 }
 0x217   :  { %v161_v37 = vmul.f32 0.03125, %v157_v36 }
 0x219   :  { %v163_v38 = vadd.f32 1e-05, %v161_v37 }
 0x21a   :  { %v160_v39 = vpop.xlane.xlu1 %159 }
 0x21b   :  { %243 = vrsqrt.f32 %v163_v38  ;;  %v162_v40 = vmul.f32 0.03125, %v160_v39 }
 0x21d   :  { %v164_v41 = vadd.f32 1e-05, %v162_v40 }
 0x21f   :  { %245 = vrsqrt.f32 %v164_v41 }
 0x225   :  { %v244_v42 = vpop.eup %243 }
 0x226   :  { %v167_v44 = vmul.f32 %v244_v42, %v151_v28 }
 0x228   :  { %v176_v46 = vmul.f32 %v209_v43, %v167_v44 }
 0x229   :  { %v246_v47 = vpop.eup %245 }
 0x22a   :  { %v185_v48 = vadd.f32 %v210_v45, %v176_v46  ;;  %v168_v49 = vmul.f32 %v246_v47, %v152_v32 }
 0x22c   :  { %v213_v50 = vpack.c.bf16 %v185_v48, %v185_v48  ;;  %v177_v51 = vmul.f32 %v209_v43, %v168_v49 }
 0x22e   :  { %196 = vst.msk [vmem:[%s331_s6] sm:$0xf] %vm195_vm3, %v213_v50  ;;  %v186_v52 = vadd.f32 %v210_v45, %v177_v51 }
 0x230   :  { %v214_v53 = vpack.c.bf16 %v186_v52, %v186_v52 }
 0x232   :  { %197 = vst.msk [vmem:[%s331_s6 + $0x4] sm:$0xf] %vm195_vm3, %v214_v53 }

</bundles_post_ra>
